<compile_context>
chip_gen: v5e
topology: v5e:2x2
jax: 0.10.0
libtpu: 0.0.40
codegen_flags: <defaults>
</compile_context>

<pallas_src>
import functools

import jax
import jax.numpy as jnp
from jax.experimental import pallas as pl
from jax.experimental.pallas import tpu as pltpu


def _round_up(x: int, m: int) -> int:
    return (x + m - 1) // m * m


def _cdiv(a: int, b: int) -> int:
    return (a + b - 1) // b


def _fused_discriminator_kernel(*refs, n_hidden_layers: int):
    """refs = (x_ref, w0, b0, ..., w_{L-1}, b_{L-1}, wp, bp, o_ref).

    x_ref : (tm, F0) native dtype (cast to bf16 in-kernel for the MXU)
    w_i   : (K_i, N_i) bf16        b_i : (1, N_i) f32
    wp    : (1, F_last) f32        bp  : (1, 1) f32
    o_ref : (1, tm) f32            lane-dense probabilities for this row tile.
    """
    x_ref = refs[0]
    o_ref = refs[-1]
    lref = refs[1:-1]

    if n_hidden_layers == 0:
        h_f32 = x_ref[...].astype(jnp.float32)
    else:
        h_lo = x_ref[...].astype(jnp.bfloat16)      # in-kernel cast: no extra HBM pass
        h_f32 = None
        for li in range(n_hidden_layers):           # static unroll at trace time
            w = lref[2 * li][...]                   # bf16 (K, N)
            b = lref[2 * li + 1][...]               # f32  (1, N)
            y = jnp.dot(h_lo, w, preferred_element_type=jnp.float32)  # MXU, f32 accumulate
            y = jnp.maximum(y + b, 0.0)             # Linear -> Dropout(identity, eval) -> ReLU
            h_f32 = y
            if li + 1 < n_hidden_layers:
                h_lo = y.astype(jnp.bfloat16)

    # Sigmoid head (F_last -> 1): contract wp (1, F) against h (tm, F) on the feature axis so the
    # result is (1, tm) -> lane-dense store (unmasked vst) instead of tm/8 masked column stores.
    wp = lref[-2][...]                              # f32 (1, F_last)
    bp = lref[-1][...]                              # f32 (1, 1)
    logit = jax.lax.dot_general(
        wp, h_f32, (((1,), (1,)), ((), ())), preferred_element_type=jnp.float32
    )                                               # (1, tm)
    o_ref[...] = jax.nn.sigmoid(logit + bp).astype(o_ref.dtype)


def prepare_discriminator_params(params, prob_params):
    """Cast / reshape weights ONCE (callers should cache the result, not re-cast every forward)."""
    layers = []
    for (w, b) in params:
        layers.append(
            (jnp.asarray(w, jnp.bfloat16), jnp.asarray(b, jnp.float32).reshape(1, -1))
        )
    w_p, b_p = prob_params
    wp_row = jnp.asarray(w_p, jnp.float32).reshape(1, -1)   # (1, F_last)
    bp = jnp.asarray(b_p, jnp.float32).reshape(1, 1)        # (1, 1)
    return layers, (wp_row, bp)


def discriminator_forward(x, prepared_params, *, tm: int = 512, training: bool = False):
    """x: [B, C, W, H] with H == hidden_dim. Returns [B, C, W, 1] probabilities."""
    if training:
        # TODO(synk): stochastic Dropout(p=0.2) for training mode is not implemented.
        raise NotImplementedError("Only eval-mode (dropout = identity) is supported.")

    layers, (wp_row, bp) = prepared_params
    orig_shape = x.shape
    feat = orig_shape[-1]
    x2 = x.reshape(-1, feat)          # native dtype; bf16 cast happens inside the kernel
    M = x2.shape[0]
    f_last = wp_row.shape[1]
    x_bytes = x2.dtype.itemsize

    # Row tile: multiple of 8, sized to minimize padding, and >=2 grid steps when M allows so
    # dimension_semantics=("parallel",) can shard row tiles across both v7x TensorCores.
    min_tiles = 2 if M >= 16 else 1
    tm_cap = max(8, _round_up(min(tm, M), 8))
    num_tiles = max(min_tiles, _cdiv(M, tm_cap))
    tm_eff = _round_up(_cdiv(M, num_tiles), 8)
    num_tiles = _cdiv(M, tm_eff)
    M_pad = num_tiles * tm_eff
    # No wrapper-side pad: Pallas masks the overhanging rows of the last tile; rows are
    # independent and the padded output rows are sliced away below.

    def build_and_run(single_buffer: bool):
        def const_spec(shape):
            if single_buffer:
                # Constant block index -> one resident copy suffices; halves weight VMEM.
                return pl.BlockSpec(shape, lambda i: (0, 0), pipeline_mode=pl.Buffered(1))
            return pl.BlockSpec(shape, lambda i: (0, 0))

        inputs = [x2]
        in_specs = [pl.BlockSpec((tm_eff, feat), lambda i: (i, 0))]
        flops = 0
        weight_bytes = 0
        max_n = f_last
        for (w, b) in layers:
            k_dim, n_dim = w.shape
            inputs += [w, b]
            in_specs += [const_spec((k_dim, n_dim)), const_spec((1, n_dim))]
            flops += 2 * M_pad * k_dim * n_dim
            weight_bytes += w.size * w.dtype.itemsize + b.size * b.dtype.itemsize
            max_n = max(max_n, n_dim)
        inputs += [wp_row, bp]
        in_specs += [const_spec((1, f_last)), const_spec((1, 1))]
        flops += 2 * M_pad * f_last
        weight_bytes += wp_row.size * 4 + 4

        bytes_accessed = M * feat * x_bytes + weight_bytes + M_pad * 4

        # Explicit VMEM budget: (single-buffered) weights + double-buffered x/out tiles + generous
        # headroom for the per-layer f32/bf16 activations; clamped below the v7x 64 MiB budget.
        weight_buf = weight_bytes * (1 if single_buffer else 2)
        io_buf = 2 * tm_eff * feat * x_bytes + 2 * tm_eff * 4
        act_buf = 6 * tm_eff * max_n * 4
        vmem_limit = int(
            min(max(2 * (weight_buf + io_buf + act_buf) + (4 << 20), 16 << 20), 56 << 20)
        )

        kernel = functools.partial(_fused_discriminator_kernel, n_hidden_layers=len(layers))
        return pl.pallas_call(
            kernel,
            out_shape=jax.ShapeDtypeStruct((num_tiles, 1, tm_eff), jnp.float32),
            grid=(num_tiles,),
            in_specs=in_specs,
            # Leading dim squeezed out; kernel sees a lane-dense (1, tm_eff) output block.
            out_specs=pl.BlockSpec((None, 1, tm_eff), lambda i: (i, 0, 0)),
            compiler_params=pltpu.CompilerParams(
                dimension_semantics=("parallel",),
                vmem_limit_bytes=vmem_limit,
            ),
            cost_estimate=pl.CostEstimate(
                flops=int(flops), transcendentals=int(M_pad), bytes_accessed=int(bytes_accessed)
            ),
        )(*inputs)

    try:
        out = jax.block_until_ready(build_and_run(single_buffer=True))
    except Exception:
        # Fallback for JAX builds where pl.Buffered(1) single-buffering is rejected.
        out = jax.block_until_ready(build_and_run(single_buffer=False))

    probs = out.reshape(-1)[:M]
    return probs.reshape(orig_shape[:-1] + (1,))


def init_discriminator_params(key, hidden_dim, n_layers):
    """Deterministic synthetic params matching the PyTorch module's shapes.

    PyTorch nn.Linear stores weight as (out, in); we store the transposed (in, out)
    form directly since y = x @ W.T + b.
    """
    params = []
    in_dim = hidden_dim
    dims = []
    for _ in range(n_layers):
        dims.append((in_dim, in_dim * 4))
        in_dim = in_dim * 4
    for _ in range(n_layers):
        dims.append((in_dim, int(in_dim / 4)))
        in_dim = int(in_dim / 4)
    for (din, dout) in dims:
        key, kw, kb = jax.random.split(key, 3)
        scale = 1.0 / jnp.sqrt(jnp.float32(din))
        w = jax.random.uniform(kw, (din, dout), jnp.float32, -scale, scale)
        b = jax.random.uniform(kb, (dout,), jnp.float32, -scale, scale)
        params.append((w, b))
    # final prob head: in_dim -> 1
    key, kw, kb = jax.random.split(key, 3)
    scale = 1.0 / jnp.sqrt(jnp.float32(in_dim))
    w_p = jax.random.uniform(kw, (in_dim, 1), jnp.float32, -scale, scale)
    b_p = jax.random.uniform(kb, (1,), jnp.float32, -scale, scale)
    return params, (w_p, b_p)


def reference_forward(x, params, prob_params):
    """Pure-f32 JAX reference of the PyTorch forward (eval mode)."""
    h = x.reshape(-1, x.shape[-1]).astype(jnp.float32)
    for (w, b) in params:
        h = jnp.maximum(h @ w + b, 0.0)
    w_p, b_p = prob_params
    p = jax.nn.sigmoid(h @ w_p + b_p)
    return p.reshape(x.shape[:-1] + (1,))


if __name__ == "__main__":
    hidden_dim = 32
    n_layers = 2
    B, C, W = 2, 4, 8  # x: [B, C, W, hidden_dim] -> M = 64 rows, 2 grid tiles

    key = jax.random.PRNGKey(0)
    key, kx = jax.random.split(key)
    x = jax.random.normal(kx, (B, C, W, hidden_dim), jnp.float32)

    params, prob_params = init_discriminator_params(key, hidden_dim, n_layers)
    prepared = prepare_discriminator_params(params, prob_params)  # cast weights ONCE

    out = discriminator_forward(x, prepared)
    out = jax.block_until_ready(out)

    ref = reference_forward(x, params, prob_params)
    assert out.shape == (B, C, W, 1), out.shape
    # bf16 matmuls with f32 accumulation -> loosened tolerance vs the pure-f32 reference.
    max_err = float(jnp.max(jnp.abs(out - ref)))
    assert jnp.allclose(out, ref, atol=2e-2, rtol=2e-2), max_err

    print("KERNEL_OK")
</pallas_src>

<mosaic_0001>
module attributes {stable_mosaic.version = 11 : i64} {
  func.func @_fused_discriminator_kernel(%arg0: i32, %arg1: memref<32x32xf32, #tpu.memory_space<vmem>>, %arg2: memref<32x128xbf16, #tpu.memory_space<vmem>>, %arg3: memref<1x128xf32, #tpu.memory_space<vmem>>, %arg4: memref<128x512xbf16, #tpu.memory_space<vmem>>, %arg5: memref<1x512xf32, #tpu.memory_space<vmem>>, %arg6: memref<512x128xbf16, #tpu.memory_space<vmem>>, %arg7: memref<1x128xf32, #tpu.memory_space<vmem>>, %arg8: memref<128x32xbf16, #tpu.memory_space<vmem>>, %arg9: memref<1x32xf32, #tpu.memory_space<vmem>>, %arg10: memref<1x32xf32, #tpu.memory_space<vmem>>, %arg11: memref<1x1xf32, #tpu.memory_space<vmem>>, %arg12: memref<1x1x32xf32, #tpu.memory_space<vmem>>) attributes {dimension_semantics = [#tpu.dimension_semantics<parallel>], iteration_bounds = array<i64: 2>, scalar_prefetch = 0 : i64, scratch_operands = 0 : i64, tpu.core_type = #tpu.core_type<tc>, window_params = [{transform_indices = @transform_0, window_bounds = array<i64: 32, 32>}, {pipeline_mode = #tpu.pipeline_mode<synchronous>, transform_indices = @transform_1, window_bounds = array<i64: 32, 128>}, {pipeline_mode = #tpu.pipeline_mode<synchronous>, transform_indices = @transform_2, window_bounds = array<i64: 1, 128>}, {pipeline_mode = #tpu.pipeline_mode<synchronous>, transform_indices = @transform_3, window_bounds = array<i64: 128, 512>}, {pipeline_mode = #tpu.pipeline_mode<synchronous>, transform_indices = @transform_4, window_bounds = array<i64: 1, 512>}, {pipeline_mode = #tpu.pipeline_mode<synchronous>, transform_indices = @transform_5, window_bounds = array<i64: 512, 128>}, {pipeline_mode = #tpu.pipeline_mode<synchronous>, transform_indices = @transform_6, window_bounds = array<i64: 1, 128>}, {pipeline_mode = #tpu.pipeline_mode<synchronous>, transform_indices = @transform_7, window_bounds = array<i64: 128, 32>}, {pipeline_mode = #tpu.pipeline_mode<synchronous>, transform_indices = @transform_8, window_bounds = array<i64: 1, 32>}, {pipeline_mode = #tpu.pipeline_mode<synchronous>, transform_indices = @transform_9, window_bounds = array<i64: 1, 32>}, {pipeline_mode = #tpu.pipeline_mode<synchronous>, transform_indices = @transform_10, window_bounds = array<i64: 1, 1>}, {transform_indices = @transform_11, window_bounds = array<i64: 1, 1, 32>}]} {
    %c0 = arith.constant 0 : index
    %c0_0 = arith.constant 0 : index
    %0 = vector.load %arg1[%c0, %c0_0] : memref<32x32xf32, #tpu.memory_space<vmem>>, vector<32x32xf32>
    %1 = arith.truncf %0 : vector<32x32xf32> to vector<32x32xbf16>
    %c0_1 = arith.constant 0 : index
    %c0_2 = arith.constant 0 : index
    %2 = vector.load %arg2[%c0_1, %c0_2] : memref<32x128xbf16, #tpu.memory_space<vmem>>, vector<32x128xbf16>
    %c0_3 = arith.constant 0 : index
    %c0_4 = arith.constant 0 : index
    %3 = vector.load %arg3[%c0_3, %c0_4] : memref<1x128xf32, #tpu.memory_space<vmem>>, vector<1x128xf32>
    %cst = arith.constant dense<0.000000e+00> : vector<32x128xf32>
    %4 = tpu.matmul %1, %2, %cst {dimension_numbers = #tpu.dot_dimension_numbers<[1], [0], [0], [1], [0, 0, 1, 1], [], []>} : vector<32x32xbf16>, vector<32x128xbf16>, vector<32x128xf32> -> vector<32x128xf32>
    %5 = vector.broadcast %3 : vector<1x128xf32> to vector<32x128xf32>
    %6 = arith.addf %4, %5 : vector<32x128xf32>
    %cst_5 = arith.constant 0.000000e+00 : f32
    %7 = vector.broadcast %cst_5 : f32 to vector<32x128xf32>
    %8 = arith.maximumf %6, %7 : vector<32x128xf32>
    %9 = arith.truncf %8 : vector<32x128xf32> to vector<32x128xbf16>
    %c0_6 = arith.constant 0 : index
    %c0_7 = arith.constant 0 : index
    %10 = vector.load %arg4[%c0_6, %c0_7] : memref<128x512xbf16, #tpu.memory_space<vmem>>, vector<128x512xbf16>
    %c0_8 = arith.constant 0 : index
    %c0_9 = arith.constant 0 : index
    %11 = vector.load %arg5[%c0_8, %c0_9] : memref<1x512xf32, #tpu.memory_space<vmem>>, vector<1x512xf32>
    %cst_10 = arith.constant dense<0.000000e+00> : vector<32x512xf32>
    %12 = tpu.matmul %9, %10, %cst_10 {dimension_numbers = #tpu.dot_dimension_numbers<[1], [0], [0], [1], [0, 0, 1, 1], [], []>} : vector<32x128xbf16>, vector<128x512xbf16>, vector<32x512xf32> -> vector<32x512xf32>
    %13 = vector.broadcast %11 : vector<1x512xf32> to vector<32x512xf32>
    %14 = arith.addf %12, %13 : vector<32x512xf32>
    %cst_11 = arith.constant 0.000000e+00 : f32
    %15 = vector.broadcast %cst_11 : f32 to vector<32x512xf32>
    %16 = arith.maximumf %14, %15 : vector<32x512xf32>
    %17 = arith.truncf %16 : vector<32x512xf32> to vector<32x512xbf16>
    %c0_12 = arith.constant 0 : index
    %c0_13 = arith.constant 0 : index
    %18 = vector.load %arg6[%c0_12, %c0_13] : memref<512x128xbf16, #tpu.memory_space<vmem>>, vector<512x128xbf16>
    %c0_14 = arith.constant 0 : index
    %c0_15 = arith.constant 0 : index
    %19 = vector.load %arg7[%c0_14, %c0_15] : memref<1x128xf32, #tpu.memory_space<vmem>>, vector<1x128xf32>
    %cst_16 = arith.constant dense<0.000000e+00> : vector<32x128xf32>
    %20 = tpu.matmul %17, %18, %cst_16 {dimension_numbers = #tpu.dot_dimension_numbers<[1], [0], [0], [1], [0, 0, 1, 1], [], []>} : vector<32x512xbf16>, vector<512x128xbf16>, vector<32x128xf32> -> vector<32x128xf32>
    %21 = vector.broadcast %19 : vector<1x128xf32> to vector<32x128xf32>
    %22 = arith.addf %20, %21 : vector<32x128xf32>
    %cst_17 = arith.constant 0.000000e+00 : f32
    %23 = vector.broadcast %cst_17 : f32 to vector<32x128xf32>
    %24 = arith.maximumf %22, %23 : vector<32x128xf32>
    %25 = arith.truncf %24 : vector<32x128xf32> to vector<32x128xbf16>
    %c0_18 = arith.constant 0 : index
    %c0_19 = arith.constant 0 : index
    %26 = vector.load %arg8[%c0_18, %c0_19] : memref<128x32xbf16, #tpu.memory_space<vmem>>, vector<128x32xbf16>
    %c0_20 = arith.constant 0 : index
    %c0_21 = arith.constant 0 : index
    %27 = vector.load %arg9[%c0_20, %c0_21] : memref<1x32xf32, #tpu.memory_space<vmem>>, vector<1x32xf32>
    %cst_22 = arith.constant dense<0.000000e+00> : vector<32x32xf32>
    %28 = tpu.matmul %25, %26, %cst_22 {dimension_numbers = #tpu.dot_dimension_numbers<[1], [0], [0], [1], [0, 0, 1, 1], [], []>} : vector<32x128xbf16>, vector<128x32xbf16>, vector<32x32xf32> -> vector<32x32xf32>
    %29 = vector.broadcast %27 : vector<1x32xf32> to vector<32x32xf32>
    %30 = arith.addf %28, %29 : vector<32x32xf32>
    %cst_23 = arith.constant 0.000000e+00 : f32
    %31 = vector.broadcast %cst_23 : f32 to vector<32x32xf32>
    %32 = arith.maximumf %30, %31 : vector<32x32xf32>
    %c0_24 = arith.constant 0 : index
    %c0_25 = arith.constant 0 : index
    %33 = vector.load %arg10[%c0_24, %c0_25] : memref<1x32xf32, #tpu.memory_space<vmem>>, vector<1x32xf32>
    %c0_26 = arith.constant 0 : index
    %c0_27 = arith.constant 0 : index
    %34 = vector.load %arg11[%c0_26, %c0_27] : memref<1x1xf32, #tpu.memory_space<vmem>>, vector<1x1xf32>
    %cst_28 = arith.constant dense<0.000000e+00> : vector<1x32xf32>
    %35 = tpu.matmul %33, %32, %cst_28 {dimension_numbers = #tpu.dot_dimension_numbers<[1], [1], [0], [0], [0, 0, 1, 0], [], []>} : vector<1x32xf32>, vector<32x32xf32>, vector<1x32xf32> -> vector<1x32xf32>
    %36 = vector.broadcast %34 : vector<1x1xf32> to vector<1x32xf32>
    %37 = arith.addf %35, %36 : vector<1x32xf32>
    %38 = arith.negf %37 : vector<1x32xf32>
    %39 = math.exp %38 : vector<1x32xf32>
    %cst_29 = arith.constant 1.000000e+00 : f32
    %40 = vector.broadcast %cst_29 : f32 to vector<1x32xf32>
    %41 = arith.addf %40, %39 : vector<1x32xf32>
    %42 = arith.divf %40, %41 : vector<1x32xf32>
    %c0_30 = arith.constant 0 : index
    %c0_31 = arith.constant 0 : index
    %c0_32 = arith.constant 0 : index
    %43 = vector.load %arg12[%c0_30, %c0_31, %c0_32] : memref<1x1x32xf32, #tpu.memory_space<vmem>>, vector<1x1x32xf32>
    %44 = vector.shape_cast %43 : vector<1x1x32xf32> to vector<1x32xf32>
    %45 = vector.shape_cast %42 : vector<1x32xf32> to vector<1x1x32xf32>
    tpu.vector_store %arg12[%c0_30, %c0_31, %c0_32], %45 {strides = array<i32>} : memref<1x1x32xf32, #tpu.memory_space<vmem>>, vector<1x1x32xf32>,
    return
  }
  func.func @transform_0(%arg0: i32) -> (i32, i32) {
    %c0_i32 = arith.constant 0 : i32
    %c0_i32_0 = arith.constant 0 : i32
    return %arg0, %c0_i32 : i32, i32
  }
  func.func @transform_1(%arg0: i32) -> (i32, i32) {
    %c0_i32 = arith.constant 0 : i32
    %c0_i32_0 = arith.constant 0 : i32
    %c0_i32_1 = arith.constant 0 : i32
    return %c0_i32, %c0_i32_0 : i32, i32
  }
  func.func @transform_2(%arg0: i32) -> (i32, i32) {
    %c0_i32 = arith.constant 0 : i32
    %c0_i32_0 = arith.constant 0 : i32
    %c0_i32_1 = arith.constant 0 : i32
    return %c0_i32, %c0_i32_0 : i32, i32
  }
  func.func @transform_3(%arg0: i32) -> (i32, i32) {
    %c0_i32 = arith.constant 0 : i32
    %c0_i32_0 = arith.constant 0 : i32
    %c0_i32_1 = arith.constant 0 : i32
    return %c0_i32, %c0_i32_0 : i32, i32
  }
  func.func @transform_4(%arg0: i32) -> (i32, i32) {
    %c0_i32 = arith.constant 0 : i32
    %c0_i32_0 = arith.constant 0 : i32
    %c0_i32_1 = arith.constant 0 : i32
    return %c0_i32, %c0_i32_0 : i32, i32
  }
  func.func @transform_5(%arg0: i32) -> (i32, i32) {
    %c0_i32 = arith.constant 0 : i32
    %c0_i32_0 = arith.constant 0 : i32
    %c0_i32_1 = arith.constant 0 : i32
    return %c0_i32, %c0_i32_0 : i32, i32
  }
  func.func @transform_6(%arg0: i32) -> (i32, i32) {
    %c0_i32 = arith.constant 0 : i32
    %c0_i32_0 = arith.constant 0 : i32
    %c0_i32_1 = arith.constant 0 : i32
    return %c0_i32, %c0_i32_0 : i32, i32
  }
  func.func @transform_7(%arg0: i32) -> (i32, i32) {
    %c0_i32 = arith.constant 0 : i32
    %c0_i32_0 = arith.constant 0 : i32
    %c0_i32_1 = arith.constant 0 : i32
    return %c0_i32, %c0_i32_0 : i32, i32
  }
  func.func @transform_8(%arg0: i32) -> (i32, i32) {
    %c0_i32 = arith.constant 0 : i32
    %c0_i32_0 = arith.constant 0 : i32
    %c0_i32_1 = arith.constant 0 : i32
    return %c0_i32, %c0_i32_0 : i32, i32
  }
  func.func @transform_9(%arg0: i32) -> (i32, i32) {
    %c0_i32 = arith.constant 0 : i32
    %c0_i32_0 = arith.constant 0 : i32
    %c0_i32_1 = arith.constant 0 : i32
    return %c0_i32, %c0_i32_0 : i32, i32
  }
  func.func @transform_10(%arg0: i32) -> (i32, i32) {
    %c0_i32 = arith.constant 0 : i32
    %c0_i32_0 = arith.constant 0 : i32
    %c0_i32_1 = arith.constant 0 : i32
    return %c0_i32, %c0_i32_0 : i32, i32
  }
  func.func @transform_11(%arg0: i32) -> (i32, i32, i32) {
    %c0_i32 = arith.constant 0 : i32
    %c0_i32_0 = arith.constant 0 : i32
    %c0_i32_1 = arith.constant 0 : i32
    return %arg0, %c0_i32, %c0_i32_0 : i32, i32, i32
  }
}

module attributes {stable_mosaic.version = 11 : i64} {
  func.func @_fused_discriminator_kernel(%arg0: i32, %arg1: memref<32x32xf32, #tpu.memory_space<vmem>>, %arg2: memref<32x128xbf16, #tpu.memory_space<vmem>>, %arg3: memref<1x128xf32, #tpu.memory_space<vmem>>, %arg4: memref<128x512xbf16, #tpu.memory_space<vmem>>, %arg5: memref<1x512xf32, #tpu.memory_space<vmem>>, %arg6: memref<512x128xbf16, #tpu.memory_space<vmem>>, %arg7: memref<1x128xf32, #tpu.memory_space<vmem>>, %arg8: memref<128x32xbf16, #tpu.memory_space<vmem>>, %arg9: memref<1x32xf32, #tpu.memory_space<vmem>>, %arg10: memref<1x32xf32, #tpu.memory_space<vmem>>, %arg11: memref<1x1xf32, #tpu.memory_space<vmem>>, %arg12: memref<1x1x32xf32, #tpu.memory_space<vmem>>) attributes {dimension_semantics = [#tpu.dimension_semantics<parallel>], iteration_bounds = array<i64: 2>, scalar_prefetch = 0 : i64, scratch_operands = 0 : i64, tpu.core_type = #tpu.core_type<tc>, window_params = [{transform_indices = @transform_0, window_bounds = array<i64: 32, 32>}, {pipeline_mode = #tpu.pipeline_mode<synchronous>, transform_indices = @transform_1, window_bounds = array<i64: 32, 128>}, {pipeline_mode = #tpu.pipeline_mode<synchronous>, transform_indices = @transform_2, window_bounds = array<i64: 1, 128>}, {pipeline_mode = #tpu.pipeline_mode<synchronous>, transform_indices = @transform_3, window_bounds = array<i64: 128, 512>}, {pipeline_mode = #tpu.pipeline_mode<synchronous>, transform_indices = @transform_4, window_bounds = array<i64: 1, 512>}, {pipeline_mode = #tpu.pipeline_mode<synchronous>, transform_indices = @transform_5, window_bounds = array<i64: 512, 128>}, {pipeline_mode = #tpu.pipeline_mode<synchronous>, transform_indices = @transform_6, window_bounds = array<i64: 1, 128>}, {pipeline_mode = #tpu.pipeline_mode<synchronous>, transform_indices = @transform_7, window_bounds = array<i64: 128, 32>}, {pipeline_mode = #tpu.pipeline_mode<synchronous>, transform_indices = @transform_8, window_bounds = array<i64: 1, 32>}, {pipeline_mode = #tpu.pipeline_mode<synchronous>, transform_indices = @transform_9, window_bounds = array<i64: 1, 32>}, {pipeline_mode = #tpu.pipeline_mode<synchronous>, transform_indices = @transform_10, window_bounds = array<i64: 1, 1>}, {transform_indices = @transform_11, window_bounds = array<i64: 1, 1, 32>}]} {
    %c0 = arith.constant 0 : index
    %c0_0 = arith.constant 0 : index
    %0 = vector.load %arg1[%c0, %c0_0] : memref<32x32xf32, #tpu.memory_space<vmem>>, vector<32x32xf32>
    %1 = arith.truncf %0 : vector<32x32xf32> to vector<32x32xbf16>
    %c0_1 = arith.constant 0 : index
    %c0_2 = arith.constant 0 : index
    %2 = vector.load %arg2[%c0_1, %c0_2] : memref<32x128xbf16, #tpu.memory_space<vmem>>, vector<32x128xbf16>
    %c0_3 = arith.constant 0 : index
    %c0_4 = arith.constant 0 : index
    %3 = vector.load %arg3[%c0_3, %c0_4] : memref<1x128xf32, #tpu.memory_space<vmem>>, vector<1x128xf32>
    %cst = arith.constant dense<0.000000e+00> : vector<32x128xf32>
    %4 = tpu.matmul %1, %2, %cst {dimension_numbers = #tpu.dot_dimension_numbers<[1], [0], [0], [1], [0, 0, 1, 1], [], []>} : vector<32x32xbf16>, vector<32x128xbf16>, vector<32x128xf32> -> vector<32x128xf32>
    %5 = vector.broadcast %3 : vector<1x128xf32> to vector<32x128xf32>
    %6 = arith.addf %4, %5 : vector<32x128xf32>
    %cst_5 = arith.constant 0.000000e+00 : f32
    %7 = vector.broadcast %cst_5 : f32 to vector<32x128xf32>
    %8 = arith.maximumf %6, %7 : vector<32x128xf32>
    %9 = arith.truncf %8 : vector<32x128xf32> to vector<32x128xbf16>
    %c0_6 = arith.constant 0 : index
    %c0_7 = arith.constant 0 : index
    %10 = vector.load %arg4[%c0_6, %c0_7] : memref<128x512xbf16, #tpu.memory_space<vmem>>, vector<128x512xbf16>
    %c0_8 = arith.constant 0 : index
    %c0_9 = arith.constant 0 : index
    %11 = vector.load %arg5[%c0_8, %c0_9] : memref<1x512xf32, #tpu.memory_space<vmem>>, vector<1x512xf32>
    %cst_10 = arith.constant dense<0.000000e+00> : vector<32x512xf32>
    %12 = tpu.matmul %9, %10, %cst_10 {dimension_numbers = #tpu.dot_dimension_numbers<[1], [0], [0], [1], [0, 0, 1, 1], [], []>} : vector<32x128xbf16>, vector<128x512xbf16>, vector<32x512xf32> -> vector<32x512xf32>
    %13 = vector.broadcast %11 : vector<1x512xf32> to vector<32x512xf32>
    %14 = arith.addf %12, %13 : vector<32x512xf32>
    %cst_11 = arith.constant 0.000000e+00 : f32
    %15 = vector.broadcast %cst_11 : f32 to vector<32x512xf32>
    %16 = arith.maximumf %14, %15 : vector<32x512xf32>
    %17 = arith.truncf %16 : vector<32x512xf32> to vector<32x512xbf16>
    %c0_12 = arith.constant 0 : index
    %c0_13 = arith.constant 0 : index
    %18 = vector.load %arg6[%c0_12, %c0_13] : memref<512x128xbf16, #tpu.memory_space<vmem>>, vector<512x128xbf16>
    %c0_14 = arith.constant 0 : index
    %c0_15 = arith.constant 0 : index
    %19 = vector.load %arg7[%c0_14, %c0_15] : memref<1x128xf32, #tpu.memory_space<vmem>>, vector<1x128xf32>
    %cst_16 = arith.constant dense<0.000000e+00> : vector<32x128xf32>
    %20 = tpu.matmul %17, %18, %cst_16 {dimension_numbers = #tpu.dot_dimension_numbers<[1], [0], [0], [1], [0, 0, 1, 1], [], []>} : vector<32x512xbf16>, vector<512x128xbf16>, vector<32x128xf32> -> vector<32x128xf32>
    %21 = vector.broadcast %19 : vector<1x128xf32> to vector<32x128xf32>
    %22 = arith.addf %20, %21 : vector<32x128xf32>
    %cst_17 = arith.constant 0.000000e+00 : f32
    %23 = vector.broadcast %cst_17 : f32 to vector<32x128xf32>
    %24 = arith.maximumf %22, %23 : vector<32x128xf32>
    %25 = arith.truncf %24 : vector<32x128xf32> to vector<32x128xbf16>
    %c0_18 = arith.constant 0 : index
    %c0_19 = arith.constant 0 : index
    %26 = vector.load %arg8[%c0_18, %c0_19] : memref<128x32xbf16, #tpu.memory_space<vmem>>, vector<128x32xbf16>
    %c0_20 = arith.constant 0 : index
    %c0_21 = arith.constant 0 : index
    %27 = vector.load %arg9[%c0_20, %c0_21] : memref<1x32xf32, #tpu.memory_space<vmem>>, vector<1x32xf32>
    %cst_22 = arith.constant dense<0.000000e+00> : vector<32x32xf32>
    %28 = tpu.matmul %25, %26, %cst_22 {dimension_numbers = #tpu.dot_dimension_numbers<[1], [0], [0], [1], [0, 0, 1, 1], [], []>} : vector<32x128xbf16>, vector<128x32xbf16>, vector<32x32xf32> -> vector<32x32xf32>
    %29 = vector.broadcast %27 : vector<1x32xf32> to vector<32x32xf32>
    %30 = arith.addf %28, %29 : vector<32x32xf32>
    %cst_23 = arith.constant 0.000000e+00 : f32
    %31 = vector.broadcast %cst_23 : f32 to vector<32x32xf32>
    %32 = arith.maximumf %30, %31 : vector<32x32xf32>
    %c0_24 = arith.constant 0 : index
    %c0_25 = arith.constant 0 : index
    %33 = vector.load %arg10[%c0_24, %c0_25] : memref<1x32xf32, #tpu.memory_space<vmem>>, vector<1x32xf32>
    %c0_26 = arith.constant 0 : index
    %c0_27 = arith.constant 0 : index
    %34 = vector.load %arg11[%c0_26, %c0_27] : memref<1x1xf32, #tpu.memory_space<vmem>>, vector<1x1xf32>
    %cst_28 = arith.constant dense<0.000000e+00> : vector<1x32xf32>
    %35 = tpu.matmul %33, %32, %cst_28 {dimension_numbers = #tpu.dot_dimension_numbers<[1], [1], [0], [0], [0, 0, 1, 0], [], []>} : vector<1x32xf32>, vector<32x32xf32>, vector<1x32xf32> -> vector<1x32xf32>
    %36 = vector.broadcast %34 : vector<1x1xf32> to vector<1x32xf32>
    %37 = arith.addf %35, %36 : vector<1x32xf32>
    %38 = arith.negf %37 : vector<1x32xf32>
    %39 = math.exp %38 : vector<1x32xf32>
    %cst_29 = arith.constant 1.000000e+00 : f32
    %40 = vector.broadcast %cst_29 : f32 to vector<1x32xf32>
    %41 = arith.addf %40, %39 : vector<1x32xf32>
    %42 = arith.divf %40, %41 : vector<1x32xf32>
    %c0_30 = arith.constant 0 : index
    %c0_31 = arith.constant 0 : index
    %c0_32 = arith.constant 0 : index
    %43 = vector.load %arg12[%c0_30, %c0_31, %c0_32] : memref<1x1x32xf32, #tpu.memory_space<vmem>>, vector<1x1x32xf32>
    %44 = vector.shape_cast %43 : vector<1x1x32xf32> to vector<1x32xf32>
    %45 = vector.shape_cast %42 : vector<1x32xf32> to vector<1x1x32xf32>
    tpu.vector_store %arg12[%c0_30, %c0_31, %c0_32], %45 {strides = array<i32>} : memref<1x1x32xf32, #tpu.memory_space<vmem>>, vector<1x1x32xf32>,
    return
  }
  func.func @transform_0(%arg0: i32) -> (i32, i32) {
    %c0_i32 = arith.constant 0 : i32
    %c0_i32_0 = arith.constant 0 : i32
    return %arg0, %c0_i32 : i32, i32
  }
  func.func @transform_1(%arg0: i32) -> (i32, i32) {
    %c0_i32 = arith.constant 0 : i32
    %c0_i32_0 = arith.constant 0 : i32
    %c0_i32_1 = arith.constant 0 : i32
    return %c0_i32, %c0_i32_0 : i32, i32
  }
  func.func @transform_2(%arg0: i32) -> (i32, i32) {
    %c0_i32 = arith.constant 0 : i32
    %c0_i32_0 = arith.constant 0 : i32
    %c0_i32_1 = arith.constant 0 : i32
    return %c0_i32, %c0_i32_0 : i32, i32
  }
  func.func @transform_3(%arg0: i32) -> (i32, i32) {
    %c0_i32 = arith.constant 0 : i32
    %c0_i32_0 = arith.constant 0 : i32
    %c0_i32_1 = arith.constant 0 : i32
    return %c0_i32, %c0_i32_0 : i32, i32
  }
  func.func @transform_4(%arg0: i32) -> (i32, i32) {
    %c0_i32 = arith.constant 0 : i32
    %c0_i32_0 = arith.constant 0 : i32
    %c0_i32_1 = arith.constant 0 : i32
    return %c0_i32, %c0_i32_0 : i32, i32
  }
  func.func @transform_5(%arg0: i32) -> (i32, i32) {
    %c0_i32 = arith.constant 0 : i32
    %c0_i32_0 = arith.constant 0 : i32
    %c0_i32_1 = arith.constant 0 : i32
    return %c0_i32, %c0_i32_0 : i32, i32
  }
  func.func @transform_6(%arg0: i32) -> (i32, i32) {
    %c0_i32 = arith.constant 0 : i32
    %c0_i32_0 = arith.constant 0 : i32
    %c0_i32_1 = arith.constant 0 : i32
    return %c0_i32, %c0_i32_0 : i32, i32
  }
  func.func @transform_7(%arg0: i32) -> (i32, i32) {
    %c0_i32 = arith.constant 0 : i32
    %c0_i32_0 = arith.constant 0 : i32
    %c0_i32_1 = arith.constant 0 : i32
    return %c0_i32, %c0_i32_0 : i32, i32
  }
  func.func @transform_8(%arg0: i32) -> (i32, i32) {
    %c0_i32 = arith.constant 0 : i32
    %c0_i32_0 = arith.constant 0 : i32
    %c0_i32_1 = arith.constant 0 : i32
    return %c0_i32, %c0_i32_0 : i32, i32
  }
  func.func @transform_9(%arg0: i32) -> (i32, i32) {
    %c0_i32 = arith.constant 0 : i32
    %c0_i32_0 = arith.constant 0 : i32
    %c0_i32_1 = arith.constant 0 : i32
    return %c0_i32, %c0_i32_0 : i32, i32
  }
  func.func @transform_10(%arg0: i32) -> (i32, i32) {
    %c0_i32 = arith.constant 0 : i32
    %c0_i32_0 = arith.constant 0 : i32
    %c0_i32_1 = arith.constant 0 : i32
    return %c0_i32, %c0_i32_0 : i32, i32
  }
  func.func @transform_11(%arg0: i32) -> (i32, i32, i32) {
    %c0_i32 = arith.constant 0 : i32
    %c0_i32_0 = arith.constant 0 : i32
    %c0_i32_1 = arith.constant 0 : i32
    return %arg0, %c0_i32, %c0_i32_0 : i32, i32, i32
  }
}

</mosaic_0001>

<bundles_post_ra>
// kernel: tpu_custom_call.1
= control target key start
LH: loop header
LB: loop body
LE: loop exit
PB: predicated region body
PF: predicated region fallthrough
CT: control target
= control target key end

     0   :  { %s2210_s0 = inlined_call_operand.vmem [shape: f32[64,32], index: 0, kind: input, shape index: {}]   ;;  %s2211_s1 = inlined_call_operand.vmem [shape: bf16[32,128], index: 1, kind: input, shape index: {}]   ;;  %s2212_s2 = inlined_call_operand.vmem [shape: f32[1,128], index: 2, kind: input, shape index: {}]   ;;  %s2213_s3 = inlined_call_operand.hbm [shape: bf16[128,512], index: 3, kind: input, shape index: {}]   ;;  %s2214_s4 = inlined_call_operand.vmem [shape: f32[1,512], index: 4, kind: input, shape index: {}]   ;;  %s2215_s5 = inlined_call_operand.hbm [shape: bf16[512,128], index: 5, kind: input, shape index: {}]   ;;  %s2216_s6 = inlined_call_operand.vmem [shape: f32[1,128], index: 6, kind: input, shape index: {}]   ;;  %s2217_s7 = inlined_call_operand.vmem [shape: bf16[128,32], index: 7, kind: input, shape index: {}]   ;;  %s2218_s8 = inlined_call_operand.vmem [shape: f32[1,32], index: 8, kind: input, shape index: {}]   ;;  %s2219_s9 = inlined_call_operand.vmem [shape: f32[1,32], index: 9, kind: input, shape index: {}]   ;;  %s2220_s10 = inlined_call_operand.<no memory space> [shape: f32[1,1], index: 10, kind: input, shape index: {}]   ;;  %s2221_s11 = inlined_call_operand.hbm [shape: f32[2,1,32], index: 11, kind: output, shape index: {}]  }
   0x1   :  { %2222 = sst [smem:[#allocation13_spill]] %s2213_s3  ;;  %v16_v0 = vstv %s2220_s10 }
   0x2   :  { %17 = vst [vmem:[#allocation2] sm:$0x1] %v16_v0 }
   0x3   :  { %18 = vsyncpa [#allocation4], 0 }
   0x4   :  { %19 = vsyncpa [#allocation7], 0 }
   0x5   :  { %20 = vsyncpa [#allocation5], 0 }
   0x6   :  { %22 = vsyncpa [#allocation5 + $0x1], 0  ;;  %s2043_s19 = smov 0   ;;  %s2045_s20 = smov 0  }
   0x7   :  { %s2047_s21 = smov 0   ;;  %s2049_s22 = smov 0  }
   0x8 LB: > { %s2064_s10 = sadd.s32 4294967295, %s1971_s22   ;;  %s1370_s23 = sadd.s32 4294967294, %s1971_s22   ;;  %s1971_s22 = sphi %s2049_s22, %s2232_s22   ;;  %s1967_s21 = sphi %s2047_s21, %s2231_s21   ;;  %s1963_s20 = sphi %s2045_s20, %s2230_s20   ;;  %s1959_s19 = sphi %s2043_s19, %s2229_s19  }
   0x9   : > { %s2068_s24 = sadd.s32 1, %s1971_s22   ;;  %s271_s25 = sadd.s32 1, %s1967_s21 }
   0xa   : > { %s268_s26 = ssub.s32 %s1971_s22, %s2068_s24  ;;  %p281_p0 = scmp.ne.s32.totalorder %s1967_s21, %s1963_s20 }
   0xb   : > { %p269_p1 = scmp.eq.s32.totalorder %s268_s26, 0  ;;  %p282_p2 = scmp.eq.s32.totalorder %s2064_s10, 1 }
   0xc   : > { %p287_p3 = scmp.ne.s32.totalorder %s1963_s20, %s1959_s19  ;;  %p288_p4 = scmp.eq.s32.totalorder %s1370_s23, 1 }
   0xd   : > { %s2079_s27 = scalar_select %p269_p1, %s1967_s21, %s271_s25  }
   0xe   : > { %p2081_p5 = por %p282_p2, %p281_p0  ;;  %p2085_p6 = por %p288_p4, %p287_p3 }
   0xf   : > { %2223 = sst [smem:[#allocation12_spill]] %s2079_s27  ;;  %p1371_p7 = scmp.ge.s32.totalorder %s1971_s22, 1 }
  0x10   : > { %p295_p8 = scmp.lt.s32.totalorder %s1971_s22, 3  ;;  %p1789_p9 = scmp.eq.s32.totalorder %s2064_s10, 0 }
  0x11   : > { %s2227_s3 = sld [smem:[#allocation13_spill]]  ;;  %s1973_s15 = smov [#allocation3]  }
  0x12   : > { %p2092_p10 = pnand %p1371_p7, %p295_p8  ;;  %s314_s16 = sshll.u32 %s1973_s15, 4  ;;  %s315_s16 = int_to_ptr.vmem [resolvable:$true] %s314_s16 }
  0x13   : > { %s329_s23 = sshll.u32 %s2215_s5, 4  ;;  %s1974_s25 = smov 256   ;;  %s330_s23 = int_to_ptr.hbm [resolvable:$true] %s329_s23 }
  0x14   : > { %p1778_p11 = pneg %p2092_p10  ;;  %s1975_s26 = smov 16  }
  0x15   : > { %s1976_s27 = smov [#allocation6]   ;;  %s1977_s13 = smov 64  }
  0x16   : > { %p1779_p12 = pnand %p1789_p9, %p1778_p11  ;;  %s331_s12 = sshll.u32 %s1976_s27, 4  ;;  %s332_s12 = int_to_ptr.vmem [resolvable:$true] %s331_s12 }
  0x17   : > { %s312_s14 = sshll.u32 %s2227_s3, 4  ;;  %s1978_s3 = smov 4   ;;  %s313_s14 = int_to_ptr.hbm [resolvable:$true] %s312_s14 }
  0x18   : > { %1781 = dma.hbm_to_vmem [thread:$0]  (!%p1779_p12), %s313_s14, 4096, %s315_s16, [#allocation4], %s1974_s25, %s1974_s25, %s1975_s26  }
  0x19   : > { %1784 = dma.hbm_to_vmem [thread:$0]  (!%p1779_p12), %s330_s23, 4096, %s332_s12, [#allocation7], %s1977_s13, %s1977_s13, %s1978_s3  }
  0x1a   : > { %371 = sbr.rel (%p2092_p10) target bundleno = 820 (0x334), region = 64 }
  0x1f   : > { %1946 = dma.done.wait (%p1789_p9), [#allocation4], 4096  }
  0x20   : > { %1948 = vsyncadd (%p1789_p9), [#allocation4], 4294963200 }
  0x21   : > { %1950 = dma.done.wait (%p1789_p9), [#allocation7], 4096  }
  0x22   : > { %1952 = vsyncadd (%p1789_p9), [#allocation7], 4294963200  ;;  %s1378_s27 = sshll.u32 %s2064_s10, 2  ;;  %v1687_v1 = vld [vmem:[%s2211_s1 + $0x8] sm:$0xff]  ;;  %v1686_v2 = vld [vmem:[%s2211_s1] sm:$0xff]  ;;  %vm449_vm0 = vcmask 261120   ;;  %s1289_s13 = scalar_lea.hbm %s2221_s11, %s2064_s10 }
  0x23   : > { %p417_p13 = scmp.lt.s32.totalorder %s1378_s27, 7  ;;  %462 = vmatpush.bf16.msra.mxu0 %v1687_v1  ;;  %v1504_v5 = vld [vmem:[#allocation3 + $0xe0] sm:$0xf]  ;;  %v1718_v6 = vld [vmem:[#allocation3 + $0xec] sm:$0xf0]  ;;  %s414_s25 = sand.u32 1, %s1963_s20  }
  0x24   : > { %v1716_v7 = vld [vmem:[#allocation3 + $0xe4] sm:$0xf]  ;;  %v1505_v8 = vor.u32 %v1718_v6, %v1504_v5  ;;  %v1506_v9 = vld [vmem:[#allocation3 + $0xf0] sm:$0xf0]  ;;  %v1512_v10 = vld [vmem:[#allocation3 + $0xe8] sm:$0xf] }
  0x25   : > { %s2234_s27 = smov (!%p417_p13, %s1378_s27), 7  ;;  %v1719_v11 = vld [vmem:[#allocation3 + $0xf4] sm:$0xf0]  ;;  %v1509_v12 = vor.u32 %v1716_v7, %v1506_v9  ;;  %v1717_v14 = vld [vmem:[#allocation3 + $0xec] sm:$0xf]  ;;  %s1293_s14 = sshll.u32 %s1289_s13, 4  ;;  %s1294_s14 = int_to_ptr.hbm [resolvable:$true] %s1293_s14 }
  0x26   : > { %s1379_s3 = sshll.u32 %s2234_s27, 3  ;;  %v1513_v13 = vor.u32 %v1719_v11, %v1512_v10  ;;  %v1514_v15 = vld [vmem:[#allocation3 + $0xf8] sm:$0xf0]  ;;  %v1488_v16 = vld [vmem:[#allocation3 + $0xc0] sm:$0xf]  ;;  %683 = vmatpush.bf16.msra.mxu1 %v1505_v8  ;;  %s415_s27 = scalar_lea.vmem [#allocation8], %s414_s25 }
  0x27   : > { %s2120_s15 = scalar_lea.vmem %s2210_s0, %s1379_s3  ;;  %v1517_v18 = vor.u32 %v1717_v14, %v1514_v15  ;;  %v1714_v19 = vld [vmem:[#allocation3 + $0xcc] sm:$0xf0]  ;;  %v1712_v20 = vld [vmem:[#allocation3 + $0xc4] sm:$0xf]  ;;  %v1490_v21 = vld [vmem:[#allocation3 + $0xd0] sm:$0xf0]  ;;  %463 = vmatpush.bf16.msra.mxu0 %v1686_v2  ;;  %702 = vmatpush.bf16.msra.mxu2 %v1509_v12 }
  0x28   : > { %v423_v3 = vld [vmem:[%s2120_s15] sm:$0xff]  ;;  %v424_v4 = vld [vmem:[%s2120_s15 + $0x8] sm:$0xff]  ;;  %v1489_v22 = vor.u32 %v1714_v19, %v1488_v16  ;;  %v1493_v23 = vor.u32 %v1712_v20, %v1490_v21  ;;  %v1715_v25 = vld [vmem:[#allocation3 + $0xd4] sm:$0xf0]  ;;  %721 = vmatpush.bf16.msra.mxu3 %v1513_v13  ;;  %s1291_s3 = sshll.u32 %s415_s27, 4  ;;  %vm1278_vm4 = vcmask 253952   ;;  %s1292_s3 = int_to_ptr.vmem [resolvable:$true] %s1291_s3 }
  0x29   : > { %v427_v17 = vpack.c.bf16 %v424_v4, %v423_v3  ;;  %v1496_v24 = vld [vmem:[#allocation3 + $0xc8] sm:$0xf]  ;;  %v1713_v26 = vld [vmem:[#allocation3 + $0xcc] sm:$0xf]  ;;  %v1498_v28 = vld [vmem:[#allocation3 + $0xd8] sm:$0xf0] }
  0x2a   : > { %v1497_v27 = vor.u32 %v1715_v25, %v1496_v24  ;;  %v1472_v29 = vld [vmem:[#allocation3 + $0xa0] sm:$0xf]  ;;  %v1710_v30 = vld [vmem:[#allocation3 + $0xac] sm:$0xf0]  ;;  %v1501_v31 = vor.u32 %v1713_v26, %v1498_v28  ;;  %v1708_v32 = vld [vmem:[#allocation3 + $0xa4] sm:$0xf]  ;;  %684 = vmatpush.bf16.msra.mxu1 %v1489_v22 }
  0x2b   : > { %740 = vmatpush.bf16.msrb.mxu0 %v1517_v18  ;;  %v1474_v33 = vld [vmem:[#allocation3 + $0xb0] sm:$0xf0]  ;;  %v1480_v34 = vld [vmem:[#allocation3 + $0xa8] sm:$0xf]  ;;  %v1473_v35 = vor.u32 %v1710_v30, %v1472_v29  ;;  %v1711_v36 = vld [vmem:[#allocation3 + $0xb4] sm:$0xf0]  ;;  %703 = vmatpush.bf16.msra.mxu2 %v1493_v23 }
  0x2c   : > { %1388 = vmatmul.msk.bf16.vlgmr.msra.gmra.mxu0 %vm449_vm0, %v427_v17  ;;  %v1709_v37 = vld [vmem:[#allocation3 + $0xac] sm:$0xf]  ;;  %v1482_v38 = vld [vmem:[#allocation3 + $0xb8] sm:$0xf0]  ;;  %v1477_v39 = vor.u32 %v1708_v32, %v1474_v33  ;;  %v1456_v40 = vld [vmem:[#allocation3 + $0x80] sm:$0xf]  ;;  %722 = vmatpush.bf16.msra.mxu3 %v1497_v27  ;;  %v1481_v43 = vor.u32 %v1711_v36, %v1480_v34 }
  0x2d   : > { %v1706_v41 = vld [vmem:[#allocation3 + $0x8c] sm:$0xf0]  ;;  %v1704_v42 = vld [vmem:[#allocation3 + $0x84] sm:$0xf]  ;;  %v1485_v44 = vor.u32 %v1709_v37, %v1482_v38  ;;  %v1458_v45 = vld [vmem:[#allocation3 + $0x90] sm:$0xf0] }
  0x2e   : > { %v1464_v46 = vld [vmem:[#allocation3 + $0x88] sm:$0xf]  ;;  %v1707_v47 = vld [vmem:[#allocation3 + $0x94] sm:$0xf0]  ;;  %v1705_v48 = vld [vmem:[#allocation3 + $0x8c] sm:$0xf]  ;;  %685 = vmatpush.bf16.msra.mxu1 %v1473_v35  ;;  %v1457_v50 = vor.u32 %v1706_v41, %v1456_v40  ;;  %v1461_v51 = vor.u32 %v1704_v42, %v1458_v45 }
  0x2f   : > { %741 = vmatpush.bf16.msrb.mxu0 %v1501_v31  ;;  %v1466_v49 = vld [vmem:[#allocation3 + $0x98] sm:$0xf0]  ;;  %704 = vmatpush.bf16.msra.mxu2 %v1477_v39  ;;  %v1465_v52 = vor.u32 %v1707_v47, %v1464_v46  ;;  %v425_v54 = vld [vmem:[%s2120_s15 + $0x10] sm:$0xff]  ;;  %v1440_v57 = vld [vmem:[#allocation3 + $0x60] sm:$0xf]  ;;  %s1281_s10 = scalar_lea.sflag [#allocation5], %s414_s25 }
  0x30   : > { %723 = vmatpush.bf16.msra.mxu3 %v1481_v43  ;;  %v1469_v53 = vor.u32 %v1705_v48, %v1466_v49  ;;  %v426_v55 = vld [vmem:[%s2120_s15 + $0x18] sm:$0xff]  ;;  %v1702_v58 = vld [vmem:[#allocation3 + $0x6c] sm:$0xf0]  ;;  %v1700_v59 = vld [vmem:[#allocation3 + $0x64] sm:$0xf]  ;;  %s1915_s30 = sshra.s32 %s1294_s14, 4  ;;  %s1916_s30 = int_to_ptr.hbm [resolvable:$true] %s1915_s30 }
  0x31   : > { %v428_v56 = vpack.c.bf16 %v426_v55, %v425_v54  ;;  %v1441_v60 = vor.u32 %v1702_v58, %v1440_v57  ;;  %v1442_v61 = vld [vmem:[#allocation3 + $0x70] sm:$0xf0]  ;;  %v1448_v62 = vld [vmem:[#allocation3 + $0x68] sm:$0xf]  ;;  %v1703_v63 = vld [vmem:[#allocation3 + $0x74] sm:$0xf0]  ;;  %p1922_p3 = scmp.lt.s32.totalorder %s1916_s30, %s2221_s11 }
  0x32   : > { %686 = vmatpush.bf16.msra.mxu1 %v1457_v50  ;;  %v1445_v0 = vor.u32 %v1700_v59, %v1442_v61  ;;  %v1449_v1 = vor.u32 %v1703_v63, %v1448_v62  ;;  %v1701_v2 = vld [vmem:[#allocation3 + $0x6c] sm:$0xf]  ;;  %v1450_v3 = vld [vmem:[#allocation3 + $0x78] sm:$0xf0]  ;;  %v1424_v5 = vld [vmem:[#allocation3 + $0x40] sm:$0xf] }
  0x33   : > { %742 = vmatpush.bf16.msrb.mxu0 %v1485_v44  ;;  %705 = vmatpush.bf16.msra.mxu2 %v1461_v51  ;;  %v1453_v4 = vor.u32 %v1701_v2, %v1450_v3  ;;  %v1698_v6 = vld [vmem:[#allocation3 + $0x4c] sm:$0xf0]  ;;  %v1696_v7 = vld [vmem:[#allocation3 + $0x44] sm:$0xf]  ;;  %v1426_v9 = vld [vmem:[#allocation3 + $0x50] sm:$0xf0] }
  0x34   : > { %724 = vmatpush.bf16.msra.mxu3 %v1465_v52  ;;  %v1425_v8 = vor.u32 %v1698_v6, %v1424_v5  ;;  %v1432_v10 = vld [vmem:[#allocation3 + $0x48] sm:$0xf]  ;;  %v1699_v11 = vld [vmem:[#allocation3 + $0x54] sm:$0xf0]  ;;  %v1429_v12 = vor.u32 %v1696_v7, %v1426_v9  ;;  %v1697_v14 = vld [vmem:[#allocation3 + $0x4c] sm:$0xf] }
  0x35   : > { %v1433_v13 = vor.u32 %v1699_v11, %v1432_v10  ;;  %v1434_v15 = vld [vmem:[#allocation3 + $0x58] sm:$0xf0]  ;;  %v1408_v17 = vld [vmem:[#allocation3 + $0x20] sm:$0xf]  ;;  %v1694_v18 = vld [vmem:[#allocation3 + $0x2c] sm:$0xf0] }
  0x36   : > { %687 = vmatpush.bf16.msra.mxu1 %v1441_v60  ;;  %v1437_v16 = vor.u32 %v1697_v14, %v1434_v15  ;;  %v1692_v19 = vld [vmem:[#allocation3 + $0x24] sm:$0xf]  ;;  %v1409_v20 = vor.u32 %v1694_v18, %v1408_v17  ;;  %v1410_v21 = vld [vmem:[#allocation3 + $0x30] sm:$0xf0]  ;;  %v1416_v22 = vld [vmem:[#allocation3 + $0x28] sm:$0xf] }
  0x37   : > { %743 = vmatpush.bf16.msrb.mxu0 %v1469_v53  ;;  %706 = vmatpush.bf16.msra.mxu2 %v1445_v0  ;;  %v1695_v23 = vld [vmem:[#allocation3 + $0x34] sm:$0xf0]  ;;  %v1413_v24 = vor.u32 %v1692_v19, %v1410_v21  ;;  %v1693_v26 = vld [vmem:[#allocation3 + $0x2c] sm:$0xf]  ;;  %v1418_v27 = vld [vmem:[#allocation3 + $0x38] sm:$0xf0] }
  0x38   : > { %725 = vmatpush.bf16.msra.mxu3 %v1449_v1  ;;  %v1417_v25 = vor.u32 %v1695_v23, %v1416_v22  ;;  %v1421_v28 = vor.u32 %v1693_v26, %v1418_v27  ;;  %v1392_v29 = vld [vmem:[#allocation3] sm:$0xf]  ;;  %v1690_v30 = vld [vmem:[#allocation3 + $0xc] sm:$0xf0]  ;;  %v1688_v31 = vld [vmem:[#allocation3 + $0x4] sm:$0xf] }
  0x39   : > { %v1393_v32 = vor.u32 %v1690_v30, %v1392_v29  ;;  %v1394_v33 = vld [vmem:[#allocation3 + $0x10] sm:$0xf0]  ;;  %v1400_v34 = vld [vmem:[#allocation3 + $0x8] sm:$0xf]  ;;  %v1691_v35 = vld [vmem:[#allocation3 + $0x14] sm:$0xf0] }
  0x3a   : > { %688 = vmatpush.bf16.msra.mxu1 %v1425_v8  ;;  %v1397_v36 = vor.u32 %v1688_v31, %v1394_v33  ;;  %v1401_v37 = vor.u32 %v1691_v35, %v1400_v34  ;;  %v1689_v38 = vld [vmem:[#allocation3 + $0xc] sm:$0xf]  ;;  %v1402_v39 = vld [vmem:[#allocation3 + $0x18] sm:$0xf0]  ;;  %v1726_v46 = vld [vmem:[#allocation6 + $0x30] sm:$0xff]  ;;  %s1917_s15 = scalar_lea.hbm %s1916_s30, 1 }
  0x3b   : > { %744 = vmatpush.bf16.msrb.mxu0 %v1453_v4  ;;  %707 = vmatpush.bf16.msra.mxu2 %v1429_v12  ;;  %v1405_v40 = vor.u32 %v1689_v38, %v1402_v39  ;;  %v1727_v42 = vld [vmem:[#allocation6 + $0x38] sm:$0xff]  ;;  %v1750_v47 = vld [vmem:[#allocation6 + $0xf0] sm:$0xff]  ;;  %v1725_v51 = vld [vmem:[#allocation6 + $0x28] sm:$0xff]  ;;  %p1918_p0 = scmp.ne.s32.totalorder %s1916_s30, %s1917_s15  ;;  %s1921_s18 = scalar_lea.hbm %s2221_s11, 2 }
  0x3c   : > { %1389 = vmatmul.msk.bf16.gmra.mxu0 %vm449_vm0, %v428_v56  ;;  %726 = vmatpush.bf16.msra.mxu3 %v1433_v13  ;;  %v1751_v43 = vld [vmem:[#allocation6 + $0xf8] sm:$0xff]  ;;  %v1734_v49 = vld [vmem:[#allocation6 + $0x70] sm:$0xff]  ;;  %v1749_v52 = vld [vmem:[#allocation6 + $0xe8] sm:$0xff]  ;;  %p1923_p4 = scmp.lt.s32.totalorder %s1921_s18, %s1917_s15 }
  0x3d   : > { %v1735_v44 = vld [vmem:[#allocation6 + $0x78] sm:$0xff]  ;;  %v1742_v50 = vld [vmem:[#allocation6 + $0xb0] sm:$0xff]  ;;  %v1733_v54 = vld [vmem:[#allocation6 + $0x68] sm:$0xff]  ;;  %p1919_p1 = pnand %p1918_p0, %p2081_p5 }
  0x3e   : > { %689 = vmatpush.bf16.msra.mxu1 %v1409_v20  ;;  %v1743_v45 = vld [vmem:[#allocation6 + $0xb8] sm:$0xff]  ;;  %v1741_v55 = vld [vmem:[#allocation6 + $0xa8] sm:$0xff]  ;;  %v1724_v58 = vld [vmem:[#allocation6 + $0x20] sm:$0xff]  ;;  %p1924_p7 = por %p1923_p4, %p1922_p3 }
  0x3f   : > { %745 = vmatpush.bf16.msrb.mxu0 %v1437_v16  ;;  %708 = vmatpush.bf16.msra.mxu2 %v1413_v24  ;;  %v1834_v48 = vld [vmem:[%s2212_s2] ss:$0 sm:$0xff]  ;;  %v1748_v59 = vld [vmem:[#allocation6 + $0xe0] sm:$0xff]  ;;  %v1722_v10 = vld [vmem:[#allocation6 + $0x10] sm:$0xff]  ;;  %p1920_p2 = pneg %p1919_p1 }
  0x40   : > { %727 = vmatpush.bf16.msra.mxu3 %v1417_v25  ;;  %v1723_v6 = vld [vmem:[#allocation6 + $0x18] sm:$0xff]  ;;  %v1732_v8 = vld [vmem:[#allocation6 + $0x60] sm:$0xff]  ;;  %v1746_v11 = vld [vmem:[#allocation6 + $0xd0] sm:$0xff] }
  0x41   : > { %v1747_v7 = vld [vmem:[#allocation6 + $0xd8] sm:$0xff]  ;;  %v1740_v9 = vld [vmem:[#allocation6 + $0xa0] sm:$0xff]  ;;  %v1721_v14 = vld [vmem:[#allocation6 + $0x8] sm:$0xff]  ;;  %p1925_p8 = pnand %p1924_p7, %p1920_p2 }
  0x42   : > { %690 = vmatpush.bf16.msra.mxu1 %v1393_v32  ;;  %v1731_v12 = vld [vmem:[#allocation6 + $0x58] sm:$0xff]  ;;  %v1745_v15 = vld [vmem:[#allocation6 + $0xc8] sm:$0xff]  ;;  %v1730_v16 = vld [vmem:[#allocation6 + $0x50] sm:$0xff] }
  0x43   : > { %746 = vmatpush.bf16.msrb.mxu0 %v1421_v28  ;;  %709 = vmatpush.bf16.msra.mxu2 %v1397_v36  ;;  %v1739_v13 = vld [vmem:[#allocation6 + $0x98] sm:$0xff]  ;;  %v1738_v17 = vld [vmem:[#allocation6 + $0x90] sm:$0xff]  ;;  %v1720_v18 = vld [vmem:[#allocation6] sm:$0xff] }
  0x44   : > { %728 = vmatpush.bf16.msra.mxu3 %v1401_v37  ;;  %v1744_v19 = vld [vmem:[#allocation6 + $0xc0] sm:$0xff]  ;;  %v1729_v20 = vld [vmem:[#allocation6 + $0x48] sm:$0xff] }
  0x45   : > { %v1737_v21 = vld [vmem:[#allocation6 + $0x88] sm:$0xff]  ;;  %v1728_v22 = vld [vmem:[#allocation6 + $0x40] sm:$0xff] }
  0x46   : > { %1043 = vmatpush.bf16.msrb.mxu1 %v1727_v42  ;;  %v1736_v23 = vld [vmem:[#allocation6 + $0x80] sm:$0xff] }
  0x47   : > { %747 = vmatpush.bf16.msrb.mxu0 %v1405_v40  ;;  %1062 = vmatpush.bf16.msrb.mxu2 %v1735_v44  ;;  %v513_v24 = vld [vmem:[%s2214_s4] sm:$0xf] }
  0x48   : > { %1081 = vmatpush.bf16.msrb.mxu3 %v1743_v45  ;;  %v515_v27 = vperm.slane %v513_v24, 0  ;;  %v518_v28 = vperm.slane %v513_v24, 3  ;;  %v516_v34 = vperm.slane %v513_v24, 1  ;;  %v517_v37 = vperm.slane %v513_v24, 2  ;;  %v1756_v24 = vld [vmem:[%s2217_s7 + $0x20] sm:$0xff] }
  0x4a   : > { %1044 = vmatpush.bf16.msrb.mxu1 %v1726_v46 }
  0x4b   : > { %1100 = vmatpush.bf16.msra.mxu0 %v1751_v43  ;;  %1063 = vmatpush.bf16.msrb.mxu2 %v1734_v49 }
  0x4c   : > { %1082 = vmatpush.bf16.msrb.mxu3 %v1742_v50 }
  0x4e   : > { %1045 = vmatpush.bf16.msrb.mxu1 %v1725_v51 }
  0x4f   : > { %1101 = vmatpush.bf16.msra.mxu0 %v1750_v47  ;;  %1064 = vmatpush.bf16.msrb.mxu2 %v1733_v54 }
  0x50   : > { %1083 = vmatpush.bf16.msrb.mxu3 %v1741_v55 }
  0x52   : > { %1046 = vmatpush.bf16.msrb.mxu1 %v1724_v58 }
  0x53   : > { %1102 = vmatpush.bf16.msra.mxu0 %v1749_v52  ;;  %1065 = vmatpush.bf16.msrb.mxu2 %v1732_v8 }
  0x54   : > { %1084 = vmatpush.bf16.msrb.mxu3 %v1740_v9 }
  0x56   : > { %1047 = vmatpush.bf16.msrb.mxu1 %v1723_v6 }
  0x57   : > { %1103 = vmatpush.bf16.msra.mxu0 %v1748_v59  ;;  %1066 = vmatpush.bf16.msrb.mxu2 %v1731_v12 }
  0x58   : > { %1085 = vmatpush.bf16.msrb.mxu3 %v1739_v13 }
  0x5a   : > { %1048 = vmatpush.bf16.msrb.mxu1 %v1722_v10 }
  0x5b   : > { %1104 = vmatpush.bf16.msra.mxu0 %v1747_v7  ;;  %1067 = vmatpush.bf16.msrb.mxu2 %v1730_v16 }
  0x5c   : > { %1086 = vmatpush.bf16.msrb.mxu3 %v1738_v17 }
  0x5e   : > { %1049 = vmatpush.bf16.msrb.mxu1 %v1721_v14 }
  0x5f   : > { %1105 = vmatpush.bf16.msra.mxu0 %v1746_v11  ;;  %1068 = vmatpush.bf16.msrb.mxu2 %v1729_v20 }
  0x60   : > { %1087 = vmatpush.bf16.msrb.mxu3 %v1737_v21  ;;  %v1759_v21 = vld [vmem:[%s2217_s7 + $0x38] sm:$0xff] }
  0x62   : > { %1050 = vmatpush.bf16.msrb.mxu1 %v1720_v18 }
  0x63   : > { %1106 = vmatpush.bf16.msra.mxu0 %v1745_v15  ;;  %1069 = vmatpush.bf16.msrb.mxu2 %v1728_v22  ;;  %v1758_v22 = vld [vmem:[%s2217_s7 + $0x30] sm:$0xff] }
  0x64   : > { %1088 = vmatpush.bf16.msrb.mxu3 %v1736_v23  ;;  %v1757_v23 = vld [vmem:[%s2217_s7 + $0x28] sm:$0xff] }
  0x67   : > { %1107 = vmatpush.bf16.msra.mxu0 %v1744_v19 }
  0xa9   : > { %v465_v41 = vpop.f32.mrf.mxu0 }
  0xaa   : > { %v466_v53 = vadd.f32 %v1834_v48, %v465_v41 }
  0xac   : > { %v475_v60 = vmax.f32 %v466_v53, 0.0 }
  0xb1   : > { %v467_v56 = vpop.f32.mrf.mxu0 }
  0xb2   : > { %v468_v57 = vadd.f32 %v1834_v48, %v467_v56 }
  0xb4   : > { %v476_v61 = vmax.f32 %v468_v57, 0.0 }
  0xb6   : > { %v479_v62 = vpack.c.bf16 %v476_v61, %v475_v60 }
  0xb8   : > { %691 = vmatmul.bf16.vlgmr.msra.gmra.mxu1 %v479_v62  ;;  %710 = vmatmul.bf16.vlgmr.msra.gmra.mxu2 %v479_v62 }
  0xb9   : > { %729 = vmatmul.bf16.vlgmr.msra.gmra.mxu3 %v479_v62  ;;  %748 = vmatmul.bf16.vlgmr.msrb.gmra.mxu0 %v479_v62  ;;  %v470_v63 = vpop.f32.mrf.mxu0 }
  0xba   : > { %v471_v0 = vadd.f32 %v1834_v48, %v470_v63  ;;  %1193 = vmatpush.bf16.msra.mxu1 %v1759_v21  ;;  %1760 = vmatpush.bf16.msra.mxu3 %v1759_v21 }
  0xbc   : > { %v477_v3 = vmax.f32 %v471_v0, 0.0 }
  0xbe   : > { %1194 = vmatpush.bf16.msra.mxu1 %v1758_v22  ;;  %1761 = vmatpush.bf16.msra.mxu3 %v1758_v22 }
  0xc1   : > { %v472_v1 = vpop.f32.mrf.mxu0 }
  0xc2   : > { %v473_v2 = vadd.f32 %v1834_v48, %v472_v1  ;;  %1195 = vmatpush.bf16.msra.mxu1 %v1757_v23  ;;  %1762 = vmatpush.bf16.msra.mxu3 %v1757_v23 }
  0xc4   : > { %v478_v4 = vmax.f32 %v473_v2, 0.0 }
  0xc6   : > { %v480_v5 = vpack.c.bf16 %v478_v4, %v477_v3  ;;  %1196 = vmatpush.bf16.msra.mxu1 %v1756_v24  ;;  %1763 = vmatpush.bf16.msra.mxu3 %v1756_v24 }
  0xc8   : > { %696 = vmatmul.bf16.gmra.mxu1 %v480_v5  ;;  %715 = vmatmul.bf16.gmra.mxu2 %v480_v5 }
  0xc9   : > { %734 = vmatmul.bf16.gmra.mxu3 %v480_v5  ;;  %753 = vmatmul.bf16.gmra.mxu0 %v480_v5 }
 0x135   : > { %v692_v25 = vpop.f32.mrf.mxu1 }
 0x136   : > { %v749_v26 = vpop.f32.mrf.mxu0  ;;  %v693_v30 = vadd.f32 %v692_v25, %v515_v27  ;;  %v1755_v25 = vld [vmem:[%s2217_s7 + $0x18] sm:$0xff] }
 0x137   : > { %v750_v32 = vadd.f32 %v749_v26, %v518_v28  ;;  %1197 = vmatpush.bf16.msra.mxu1 %v1755_v25  ;;  %1764 = vmatpush.bf16.msra.mxu3 %v1755_v25  ;;  %v1754_v26 = vld [vmem:[%s2217_s7 + $0x10] sm:$0xff] }
 0x138   : > { %v759_v39 = vmax.f32 %v693_v30, 0.0  ;;  %v1835_v30 = vld [vmem:[%s2216_s6] ss:$0 sm:$0xff] }
 0x139   : > { %v762_v41 = vmax.f32 %v750_v32, 0.0 }
 0x13b   : > { %v711_v29 = vpop.f32.mrf.mxu2  ;;  %1198 = vmatpush.bf16.msra.mxu1 %v1754_v26  ;;  %1765 = vmatpush.bf16.msra.mxu3 %v1754_v26 }
 0x13c   : > { %v730_v31 = vpop.f32.mrf.mxu3  ;;  %v712_v43 = vadd.f32 %v711_v29, %v516_v34 }
 0x13d   : > { %v694_v33 = vpop.f32.mrf.mxu1  ;;  %v731_v45 = vadd.f32 %v730_v31, %v517_v37 }
 0x13e   : > { %v695_v35 = vadd.f32 %v694_v33, %v515_v27  ;;  %v751_v36 = vpop.f32.mrf.mxu0  ;;  %v760_v52 = vmax.f32 %v712_v43, 0.0 }
 0x13f   : > { %v752_v38 = vadd.f32 %v751_v36, %v518_v28  ;;  %v761_v55 = vmax.f32 %v731_v45, 0.0 }
 0x140   : > { %v763_v40 = vmax.f32 %v695_v35, 0.0 }
 0x141   : > { %v766_v42 = vmax.f32 %v752_v38, 0.0 }
 0x142   : > { %v775_v44 = vpack.c.bf16 %v763_v40, %v759_v39 }
 0x143   : > { %v778_v46 = vpack.c.bf16 %v766_v42, %v762_v41  ;;  %v713_v47 = vpop.f32.mrf.mxu2 }
 0x144   : > { %v714_v48 = vadd.f32 %v713_v47, %v516_v34  ;;  %v732_v49 = vpop.f32.mrf.mxu3  ;;  %1051 = vmatmul.bf16.vlgmr.msrb.gmra.mxu1 %v775_v44 }
 0x145   : > { %v733_v50 = vadd.f32 %v732_v49, %v517_v37  ;;  %1108 = vmatmul.bf16.vlgmr.msra.gmra.mxu0 %v778_v46  ;;  %v697_v51 = vpop.f32.mrf.mxu1 }
 0x146   : > { %v764_v53 = vmax.f32 %v714_v48, 0.0  ;;  %v754_v54 = vpop.f32.mrf.mxu0  ;;  %v698_v60 = vadd.f32 %v697_v51, %v515_v27 }
 0x147   : > { %v765_v56 = vmax.f32 %v733_v50, 0.0  ;;  %v755_v62 = vadd.f32 %v754_v54, %v518_v28 }
 0x148   : > { %v776_v57 = vpack.c.bf16 %v764_v53, %v760_v52  ;;  %v767_v3 = vmax.f32 %v698_v60, 0.0 }
 0x149   : > { %v777_v58 = vpack.c.bf16 %v765_v56, %v761_v55  ;;  %v770_v5 = vmax.f32 %v755_v62, 0.0 }
 0x14a   : > { %1070 = vmatmul.bf16.vlgmr.msrb.gmra.mxu2 %v776_v57 }
 0x14b   : > { %1089 = vmatmul.bf16.vlgmr.msrb.gmra.mxu3 %v777_v58  ;;  %v716_v59 = vpop.f32.mrf.mxu2 }
 0x14c   : > { %v735_v61 = vpop.f32.mrf.mxu3  ;;  %v717_v7 = vadd.f32 %v716_v59, %v516_v34 }
 0x14d   : > { %v699_v63 = vpop.f32.mrf.mxu1  ;;  %v736_v9 = vadd.f32 %v735_v61, %v517_v37 }
 0x14e   : > { %v700_v0 = vadd.f32 %v699_v63, %v515_v27  ;;  %v756_v1 = vpop.f32.mrf.mxu0  ;;  %v768_v15 = vmax.f32 %v717_v7, 0.0  ;;  %v1753_v27 = vld [vmem:[%s2217_s7 + $0x8] sm:$0xff] }
 0x14f   : > { %v757_v2 = vadd.f32 %v756_v1, %v518_v28  ;;  %v769_v17 = vmax.f32 %v736_v9, 0.0  ;;  %1199 = vmatpush.bf16.msra.mxu1 %v1753_v27  ;;  %1766 = vmatpush.bf16.msra.mxu3 %v1753_v27  ;;  %v1752_v28 = vld [vmem:[%s2217_s7] sm:$0xff] }
 0x150   : > { %v771_v4 = vmax.f32 %v700_v0, 0.0 }
 0x151   : > { %v774_v6 = vmax.f32 %v757_v2, 0.0 }
 0x152   : > { %v779_v8 = vpack.c.bf16 %v771_v4, %v767_v3  ;;  %v1217_v4 = vld [vmem:[#allocation2] sm:$0x1] }
 0x153   : > { %v718_v10 = vpop.f32.mrf.mxu2  ;;  %v782_v11 = vpack.c.bf16 %v774_v6, %v770_v5  ;;  %1200 = vmatpush.bf16.msra.mxu1 %v1752_v28  ;;  %1767 = vmatpush.bf16.msra.mxu3 %v1752_v28  ;;  %v1979_v5 = vmov 0  }
 0x154   : > { %v719_v12 = vadd.f32 %v718_v10, %v516_v34  ;;  %v737_v13 = vpop.f32.mrf.mxu3  ;;  %1056 = vmatmul.bf16.gmra.mxu1 %v779_v8  ;;  %1833 = vset.pattern.permute.xlu0 %v1979_v5  ;;  %v1836_v8 = vld [vmem:[%s2218_s8] ss:$0 sm:$0xff] }
 0x155   : > { %v738_v14 = vadd.f32 %v737_v13, %v517_v37  ;;  %1113 = vmatmul.bf16.gmra.mxu0 %v782_v11  ;;  %1220 = vperm.xlu0 %1833, %v1217_v4  }
 0x156   : > { %v772_v16 = vmax.f32 %v719_v12, 0.0 }
 0x157   : > { %v773_v18 = vmax.f32 %v738_v14, 0.0 }
 0x158   : > { %v780_v19 = vpack.c.bf16 %v772_v16, %v768_v15 }
 0x159   : > { %v781_v20 = vpack.c.bf16 %v773_v18, %v769_v17 }
 0x15a   : > { %1075 = vmatmul.bf16.gmra.mxu2 %v780_v19  ;;  %v1216_v19 = vld [vmem:[%s2219_s9] sm:$0x1] }
 0x15b   : > { %1094 = vmatmul.bf16.gmra.mxu3 %v781_v20 }
 0x1c1   : > { %v1052_v29 = vpop.f32.mrf.mxu1 }
 0x1c2   : > { %v1109_v31 = vpop.f32.mrf.mxu0  ;;  %v1053_v34 = vadd.f32 %v1835_v30, %v1052_v29 }
 0x1c7   : > { %v1221_v20 = vpop.permute.xlu0 %1220 }
 0x1c8   : > { %v1223_v21 = vperm.slane %v1221_v20, 0 }
 0x1c9   : > { %v1054_v32 = vpop.f32.mrf.mxu1 }
 0x1ca   : > { %v1055_v37 = vadd.f32 %v1835_v30, %v1054_v32  ;;  %v1111_v39 = vpop.f32.mrf.mxu0 }
 0x1cd   : > { %v1071_v33 = vpop.f32.mrf.mxu2 }
 0x1ce   : > { %v1090_v35 = vpop.f32.mrf.mxu3  ;;  %v1072_v36 = vadd.f32 %v1071_v33, %v1053_v34 }
 0x1d0   : > { %v1091_v38 = vadd.f32 %v1090_v35, %v1072_v36 }
 0x1d1   : > { %v1057_v43 = vpop.f32.mrf.mxu1 }
 0x1d2   : > { %v1110_v44 = vadd.f32 %v1109_v31, %v1091_v38  ;;  %v1058_v50 = vadd.f32 %v1835_v30, %v1057_v43  ;;  %v1114_v53 = vpop.f32.mrf.mxu0 }
 0x1d4   : > { %v1119_v47 = vmax.f32 %v1110_v44, 0.0 }
 0x1d5   : > { %v1073_v40 = vpop.f32.mrf.mxu2 }
 0x1d6   : > { %v1074_v41 = vadd.f32 %v1073_v40, %v1055_v37  ;;  %v1092_v42 = vpop.f32.mrf.mxu3 }
 0x1d8   : > { %v1093_v45 = vadd.f32 %v1092_v42, %v1074_v41 }
 0x1d9   : > { %v1059_v55 = vpop.f32.mrf.mxu1 }
 0x1da   : > { %v1112_v46 = vadd.f32 %v1111_v39, %v1093_v45  ;;  %v1060_v56 = vadd.f32 %v1835_v30, %v1059_v55  ;;  %v1116_v63 = vpop.f32.mrf.mxu0 }
 0x1dc   : > { %v1120_v48 = vmax.f32 %v1112_v46, 0.0 }
 0x1dd   : > { %v1076_v49 = vpop.f32.mrf.mxu2 }
 0x1de   : > { %v1123_v51 = vpack.c.bf16 %v1120_v48, %v1119_v47  ;;  %v1095_v52 = vpop.f32.mrf.mxu3  ;;  %v1077_v54 = vadd.f32 %v1076_v49, %v1058_v50 }
 0x1e0   : > { %1201 = vmatmul.bf16.vlgmr.msra.gmra.mxu1 %v1123_v51  ;;  %v1096_v57 = vadd.f32 %v1095_v52, %v1077_v54 }
 0x1e2   : > { %v1115_v61 = vadd.f32 %v1114_v53, %v1096_v57 }
 0x1e4   : > { %v1121_v1 = vmax.f32 %v1115_v61, 0.0 }
 0x1e5   : > { %v1078_v58 = vpop.f32.mrf.mxu2 }
 0x1e6   : > { %v1079_v59 = vadd.f32 %v1078_v58, %v1060_v56  ;;  %v1097_v60 = vpop.f32.mrf.mxu3 }
 0x1e8   : > { %v1098_v62 = vadd.f32 %v1097_v60, %v1079_v59 }
 0x1ea   : > { %v1117_v0 = vadd.f32 %v1116_v63, %v1098_v62 }
 0x1ec   : > { %v1122_v2 = vmax.f32 %v1117_v0, 0.0 }
 0x1ee   : > { %v1124_v3 = vpack.c.bf16 %v1122_v2, %v1121_v1 }
 0x1f0   : > { %1206 = vmatmul.bf16.vlgmr.msra.gmra.mxu3 %v1124_v3 }
 0x25d   : > { %v1202_v7 = vpop.f32.mrf.mxu1 }
 0x25e   : > { %v1203_v16 = vadd.f32 %v1836_v8, %v1202_v7 }
 0x260   : > { %v1212_v18 = vmax.f32 %v1203_v16, 0.0 }
 0x265   : > { %v1204_v13 = vpop.f32.mrf.mxu1 }
 0x266   : > { %v1205_v14 = vadd.f32 %v1836_v8, %v1204_v13 }
 0x268   : > { %v1213_v17 = vmax.f32 %v1205_v14, 0.0 }
 0x273   : > { %v1207_v6 = vpop.f32.mrf.mxu3 }
 0x274   : > { %v1208_v11 = vadd.f32 %v1836_v8, %v1207_v6 }
 0x276   : > { %v1214_v15 = vmax.f32 %v1208_v11, 0.0 }
 0x27b   : > { %v1209_v9 = vpop.f32.mrf.mxu3 }
 0x27c   : > { %v1210_v10 = vadd.f32 %v1836_v8, %v1209_v9 }
 0x27e   : > { %v1215_v12 = vmax.f32 %v1210_v10, 0.0 }
 0x280   : > { %1678 = vmatpush.xpose.msk.msra.mxu2 %vm449_vm0, %v1215_v12 }
 0x284   : > { %1679 = vmatpush.xpose.msk.msra.mxu2 %vm449_vm0, %v1214_v15 }
 0x288   : > { %1680 = vmatpush.xpose.msk.msra.mxu2 %vm449_vm0, %v1213_v17 }
 0x28c   : > { %1681 = vmatpush.xpose.msk.msra.mxu2 %vm449_vm0, %v1212_v18 }
 0x28f   : > { %1682 = vmatmul.msk.f32.vlgmr.msra.gmra.mxu2 %vm449_vm0, %v1216_v19 }
 0x312   : > { %v1256_v22 = vpop.f32.mrf.mxu2 }
 0x313   : > { %v1257_v23 = vadd.f32 %v1256_v22, %v1223_v21 }
 0x315   : > { %v1683_v24 = vmul.f32 -1.442695, %v1257_v23 }
 0x317   : > { %1837 = vpow2.f32 %v1683_v24 }
 0x31d   : > { %v1838_v25 = vpop.eup %1837 }
 0x31e   : > { %v1262_v26 = vadd.f32 1.0, %v1838_v25 }
 0x320   : > { %1839 = vrcp.f32 %v1262_v26  ;;  %v1274_v30 = vand.u32 2147483648, %v1262_v26  ;;  %v1272_v32 = vand.u32 2147483647, %v1262_v26  ;;  %vm1268_vm2 = vweird.f32 %v1262_v26 }
 0x322   : > { %v1275_v34 = vor.u32 1.1754944e-38, %v1274_v30  ;;  %vm1273_vm5 = vcmp.eq.f32.partialorder %v1272_v32, 8.507059e+37 }
 0x326   : > { %v1840_v27 = vpop.eup %1839 }
 0x327   : > { %v1264_v28 = vmul.f32 %v1840_v27, %v1262_v26  ;;  %vm1269_vm1 = vweird.f32 %v1840_v27 }
 0x328   : > { %vm1270_vm3 = vmor %vm1268_vm2, %vm1269_vm1 }
 0x329   : > { %v1265_v29 = vsub.f32 1.0, %v1264_v28 }
 0x32b   : > { %v1266_v31 = vmul.f32 %v1840_v27, %v1265_v29 }
 0x32d   : > { %v1267_v33 = vadd.f32 %v1840_v27, %v1266_v31 }
 0x32f   : > { %v1271_v35 = vsel %vm1270_vm3, %v1840_v27, %v1267_v33 }
 0x330   : > { %v1276_v36 = vsel %vm1273_vm5, %v1275_v34, %v1271_v35 }
 0x331   : > { %1279 = vst.msk [vmem:[%s415_s27] sm:$0x1] %vm1278_vm4, %v1276_v36 }
 0x332   : > { %1928 = shalt.err (!%p1925_p8)
}
 0x333   : > { %1776 = dma.vmem_to_hbm [thread:$0]  (%p2081_p5), %s1292_s3, 16, %s1294_s14, %s1281_s10  }
 0x334 PF: > { %p1793_p9 = scmp.ge.s32.totalorder %s1971_s22, 2  ;;  %s1305_s25 = sand.u32 1, %s1959_s19  }
 0x335   : > { %s1306_s12 = scalar_lea.sflag [#allocation5], %s1305_s25 }
 0x336   : > { %p1786_p10 = pnand %p1793_p9, %p2085_p6 }
 0x338   : > { %p1787_p11 = pneg %p1786_p10 }
 0x33a   : > { %1954 = dma.done.wait (%p1787_p11), %s1306_s12, 16  }
 0x33b   : > { %1956 = vsyncadd (%p1787_p11), %s1306_s12, 4294967280  ;;  %s2228_s13 = sld [smem:[#allocation12_spill]]  ;;  %p25_p12 = scmp.ge.s32.totalorder %s2068_s24, 4  }
 0x33c   : > { %s2229_s19 = smov %s1963_s20  ;;  %s2230_s20 = smov %s1967_s21 }
 0x33d   : > { %s2232_s22 = smov %s2068_s24  ;;  %27 = sbr.rel (!%p25_p12) target bundleno = 8 (0x8), region = 108 }
 0x341   : > { %s2231_s21 = smov %s2228_s13 }
 0x342   :  { %1311 = vsyncpa [#allocation4], 1 }
 0x343   :  { %1313 = vsyncpa [#allocation4 + $0x1], 1 }
 0x344   :  { %1314 = vsyncpa [#allocation7], 1 }
 0x345   :  { %1315 = vsyncpa [#allocation5], 1 }
 0x346   :  { %1317 = vsyncpa [#allocation5 + $0x1], 1 }

// kernel: tpu_custom_call.1
= control target key start
LH: loop header
LB: loop body
LE: loop exit
PB: predicated region body
PF: predicated region fallthrough
CT: control target
= control target key end

     0   :  { %s2210_s0 = inlined_call_operand.vmem [shape: f32[64,32], index: 0, kind: input, shape index: {}]   ;;  %s2211_s1 = inlined_call_operand.vmem [shape: bf16[32,128], index: 1, kind: input, shape index: {}]   ;;  %s2212_s2 = inlined_call_operand.vmem [shape: f32[1,128], index: 2, kind: input, shape index: {}]   ;;  %s2213_s3 = inlined_call_operand.hbm [shape: bf16[128,512], index: 3, kind: input, shape index: {}]   ;;  %s2214_s4 = inlined_call_operand.vmem [shape: f32[1,512], index: 4, kind: input, shape index: {}]   ;;  %s2215_s5 = inlined_call_operand.hbm [shape: bf16[512,128], index: 5, kind: input, shape index: {}]   ;;  %s2216_s6 = inlined_call_operand.vmem [shape: f32[1,128], index: 6, kind: input, shape index: {}]   ;;  %s2217_s7 = inlined_call_operand.vmem [shape: bf16[128,32], index: 7, kind: input, shape index: {}]   ;;  %s2218_s8 = inlined_call_operand.vmem [shape: f32[1,32], index: 8, kind: input, shape index: {}]   ;;  %s2219_s9 = inlined_call_operand.vmem [shape: f32[1,32], index: 9, kind: input, shape index: {}]   ;;  %s2220_s10 = inlined_call_operand.<no memory space> [shape: f32[1,1], index: 10, kind: input, shape index: {}]   ;;  %s2221_s11 = inlined_call_operand.hbm [shape: f32[2,1,32], index: 11, kind: output, shape index: {}]  }
   0x1   :  { %2222 = sst [smem:[#allocation13_spill]] %s2213_s3  ;;  %v16_v0 = vstv %s2220_s10 }
   0x2   :  { %17 = vst [vmem:[#allocation2] sm:$0x1] %v16_v0 }
   0x3   :  { %18 = vsyncpa [#allocation4], 0 }
   0x4   :  { %19 = vsyncpa [#allocation7], 0 }
   0x5   :  { %20 = vsyncpa [#allocation5], 0 }
   0x6   :  { %22 = vsyncpa [#allocation5 + $0x1], 0  ;;  %s2043_s19 = smov 0   ;;  %s2045_s20 = smov 0  }
   0x7   :  { %s2047_s21 = smov 0   ;;  %s2049_s22 = smov 0  }
   0x8 LB: > { %s2064_s10 = sadd.s32 4294967295, %s1971_s22   ;;  %s1370_s23 = sadd.s32 4294967294, %s1971_s22   ;;  %s1971_s22 = sphi %s2049_s22, %s2232_s22   ;;  %s1967_s21 = sphi %s2047_s21, %s2231_s21   ;;  %s1963_s20 = sphi %s2045_s20, %s2230_s20   ;;  %s1959_s19 = sphi %s2043_s19, %s2229_s19  }
   0x9   : > { %s2068_s24 = sadd.s32 1, %s1971_s22   ;;  %s271_s25 = sadd.s32 1, %s1967_s21 }
   0xa   : > { %s268_s26 = ssub.s32 %s1971_s22, %s2068_s24  ;;  %p281_p0 = scmp.ne.s32.totalorder %s1967_s21, %s1963_s20 }
   0xb   : > { %p269_p1 = scmp.eq.s32.totalorder %s268_s26, 0  ;;  %p282_p2 = scmp.eq.s32.totalorder %s2064_s10, 1 }
   0xc   : > { %p287_p3 = scmp.ne.s32.totalorder %s1963_s20, %s1959_s19  ;;  %p288_p4 = scmp.eq.s32.totalorder %s1370_s23, 1 }
   0xd   : > { %s2079_s27 = scalar_select %p269_p1, %s1967_s21, %s271_s25  }
   0xe   : > { %p2081_p5 = por %p282_p2, %p281_p0  ;;  %p2085_p6 = por %p288_p4, %p287_p3 }
   0xf   : > { %2223 = sst [smem:[#allocation12_spill]] %s2079_s27  ;;  %p1371_p7 = scmp.ge.s32.totalorder %s1971_s22, 1 }
  0x10   : > { %p295_p8 = scmp.lt.s32.totalorder %s1971_s22, 3  ;;  %p1789_p9 = scmp.eq.s32.totalorder %s2064_s10, 0 }
  0x11   : > { %s2227_s3 = sld [smem:[#allocation13_spill]]  ;;  %s1973_s15 = smov [#allocation3]  }
  0x12   : > { %p2092_p10 = pnand %p1371_p7, %p295_p8  ;;  %s314_s16 = sshll.u32 %s1973_s15, 4  ;;  %s315_s16 = int_to_ptr.vmem [resolvable:$true] %s314_s16 }
  0x13   : > { %s329_s23 = sshll.u32 %s2215_s5, 4  ;;  %s1974_s25 = smov 256   ;;  %s330_s23 = int_to_ptr.hbm [resolvable:$true] %s329_s23 }
  0x14   : > { %p1778_p11 = pneg %p2092_p10  ;;  %s1975_s26 = smov 16  }
  0x15   : > { %s1976_s27 = smov [#allocation6]   ;;  %s1977_s13 = smov 64  }
  0x16   : > { %p1779_p12 = pnand %p1789_p9, %p1778_p11  ;;  %s331_s12 = sshll.u32 %s1976_s27, 4  ;;  %s332_s12 = int_to_ptr.vmem [resolvable:$true] %s331_s12 }
  0x17   : > { %s312_s14 = sshll.u32 %s2227_s3, 4  ;;  %s1978_s3 = smov 4   ;;  %s313_s14 = int_to_ptr.hbm [resolvable:$true] %s312_s14 }
  0x18   : > { %1781 = dma.hbm_to_vmem [thread:$0]  (!%p1779_p12), %s313_s14, 4096, %s315_s16, [#allocation4], %s1974_s25, %s1974_s25, %s1975_s26  }
  0x19   : > { %1784 = dma.hbm_to_vmem [thread:$0]  (!%p1779_p12), %s330_s23, 4096, %s332_s12, [#allocation7], %s1977_s13, %s1977_s13, %s1978_s3  }
  0x1a   : > { %371 = sbr.rel (%p2092_p10) target bundleno = 820 (0x334), region = 64 }
  0x1f   : > { %1946 = dma.done.wait (%p1789_p9), [#allocation4], 4096  }
  0x20   : > { %1948 = vsyncadd (%p1789_p9), [#allocation4], 4294963200 }
  0x21   : > { %1950 = dma.done.wait (%p1789_p9), [#allocation7], 4096  }
  0x22   : > { %1952 = vsyncadd (%p1789_p9), [#allocation7], 4294963200  ;;  %s1378_s27 = sshll.u32 %s2064_s10, 2  ;;  %v1687_v1 = vld [vmem:[%s2211_s1 + $0x8] sm:$0xff]  ;;  %v1686_v2 = vld [vmem:[%s2211_s1] sm:$0xff]  ;;  %vm449_vm0 = vcmask 261120   ;;  %s1289_s13 = scalar_lea.hbm %s2221_s11, %s2064_s10 }
  0x23   : > { %p417_p13 = scmp.lt.s32.totalorder %s1378_s27, 7  ;;  %462 = vmatpush.bf16.msra.mxu0 %v1687_v1  ;;  %v1504_v5 = vld [vmem:[#allocation3 + $0xe0] sm:$0xf]  ;;  %v1718_v6 = vld [vmem:[#allocation3 + $0xec] sm:$0xf0]  ;;  %s414_s25 = sand.u32 1, %s1963_s20  }
  0x24   : > { %v1716_v7 = vld [vmem:[#allocation3 + $0xe4] sm:$0xf]  ;;  %v1505_v8 = vor.u32 %v1718_v6, %v1504_v5  ;;  %v1506_v9 = vld [vmem:[#allocation3 + $0xf0] sm:$0xf0]  ;;  %v1512_v10 = vld [vmem:[#allocation3 + $0xe8] sm:$0xf] }
  0x25   : > { %s2234_s27 = smov (!%p417_p13, %s1378_s27), 7  ;;  %v1719_v11 = vld [vmem:[#allocation3 + $0xf4] sm:$0xf0]  ;;  %v1509_v12 = vor.u32 %v1716_v7, %v1506_v9  ;;  %v1717_v14 = vld [vmem:[#allocation3 + $0xec] sm:$0xf]  ;;  %s1293_s14 = sshll.u32 %s1289_s13, 4  ;;  %s1294_s14 = int_to_ptr.hbm [resolvable:$true] %s1293_s14 }
  0x26   : > { %s1379_s3 = sshll.u32 %s2234_s27, 3  ;;  %v1513_v13 = vor.u32 %v1719_v11, %v1512_v10  ;;  %v1514_v15 = vld [vmem:[#allocation3 + $0xf8] sm:$0xf0]  ;;  %v1488_v16 = vld [vmem:[#allocation3 + $0xc0] sm:$0xf]  ;;  %683 = vmatpush.bf16.msra.mxu1 %v1505_v8  ;;  %s415_s27 = scalar_lea.vmem [#allocation8], %s414_s25 }
  0x27   : > { %s2120_s15 = scalar_lea.vmem %s2210_s0, %s1379_s3  ;;  %v1517_v18 = vor.u32 %v1717_v14, %v1514_v15  ;;  %v1714_v19 = vld [vmem:[#allocation3 + $0xcc] sm:$0xf0]  ;;  %v1712_v20 = vld [vmem:[#allocation3 + $0xc4] sm:$0xf]  ;;  %v1490_v21 = vld [vmem:[#allocation3 + $0xd0] sm:$0xf0]  ;;  %463 = vmatpush.bf16.msra.mxu0 %v1686_v2  ;;  %702 = vmatpush.bf16.msra.mxu2 %v1509_v12 }
  0x28   : > { %v423_v3 = vld [vmem:[%s2120_s15] sm:$0xff]  ;;  %v424_v4 = vld [vmem:[%s2120_s15 + $0x8] sm:$0xff]  ;;  %v1489_v22 = vor.u32 %v1714_v19, %v1488_v16  ;;  %v1493_v23 = vor.u32 %v1712_v20, %v1490_v21  ;;  %v1715_v25 = vld [vmem:[#allocation3 + $0xd4] sm:$0xf0]  ;;  %721 = vmatpush.bf16.msra.mxu3 %v1513_v13  ;;  %s1291_s3 = sshll.u32 %s415_s27, 4  ;;  %vm1278_vm4 = vcmask 253952   ;;  %s1292_s3 = int_to_ptr.vmem [resolvable:$true] %s1291_s3 }
  0x29   : > { %v427_v17 = vpack.c.bf16 %v424_v4, %v423_v3  ;;  %v1496_v24 = vld [vmem:[#allocation3 + $0xc8] sm:$0xf]  ;;  %v1713_v26 = vld [vmem:[#allocation3 + $0xcc] sm:$0xf]  ;;  %v1498_v28 = vld [vmem:[#allocation3 + $0xd8] sm:$0xf0] }
  0x2a   : > { %v1497_v27 = vor.u32 %v1715_v25, %v1496_v24  ;;  %v1472_v29 = vld [vmem:[#allocation3 + $0xa0] sm:$0xf]  ;;  %v1710_v30 = vld [vmem:[#allocation3 + $0xac] sm:$0xf0]  ;;  %v1501_v31 = vor.u32 %v1713_v26, %v1498_v28  ;;  %v1708_v32 = vld [vmem:[#allocation3 + $0xa4] sm:$0xf]  ;;  %684 = vmatpush.bf16.msra.mxu1 %v1489_v22 }
  0x2b   : > { %740 = vmatpush.bf16.msrb.mxu0 %v1517_v18  ;;  %v1474_v33 = vld [vmem:[#allocation3 + $0xb0] sm:$0xf0]  ;;  %v1480_v34 = vld [vmem:[#allocation3 + $0xa8] sm:$0xf]  ;;  %v1473_v35 = vor.u32 %v1710_v30, %v1472_v29  ;;  %v1711_v36 = vld [vmem:[#allocation3 + $0xb4] sm:$0xf0]  ;;  %703 = vmatpush.bf16.msra.mxu2 %v1493_v23 }
  0x2c   : > { %1388 = vmatmul.msk.bf16.vlgmr.msra.gmra.mxu0 %vm449_vm0, %v427_v17  ;;  %v1709_v37 = vld [vmem:[#allocation3 + $0xac] sm:$0xf]  ;;  %v1482_v38 = vld [vmem:[#allocation3 + $0xb8] sm:$0xf0]  ;;  %v1477_v39 = vor.u32 %v1708_v32, %v1474_v33  ;;  %v1456_v40 = vld [vmem:[#allocation3 + $0x80] sm:$0xf]  ;;  %722 = vmatpush.bf16.msra.mxu3 %v1497_v27  ;;  %v1481_v43 = vor.u32 %v1711_v36, %v1480_v34 }
  0x2d   : > { %v1706_v41 = vld [vmem:[#allocation3 + $0x8c] sm:$0xf0]  ;;  %v1704_v42 = vld [vmem:[#allocation3 + $0x84] sm:$0xf]  ;;  %v1485_v44 = vor.u32 %v1709_v37, %v1482_v38  ;;  %v1458_v45 = vld [vmem:[#allocation3 + $0x90] sm:$0xf0] }
  0x2e   : > { %v1464_v46 = vld [vmem:[#allocation3 + $0x88] sm:$0xf]  ;;  %v1707_v47 = vld [vmem:[#allocation3 + $0x94] sm:$0xf0]  ;;  %v1705_v48 = vld [vmem:[#allocation3 + $0x8c] sm:$0xf]  ;;  %685 = vmatpush.bf16.msra.mxu1 %v1473_v35  ;;  %v1457_v50 = vor.u32 %v1706_v41, %v1456_v40  ;;  %v1461_v51 = vor.u32 %v1704_v42, %v1458_v45 }
  0x2f   : > { %741 = vmatpush.bf16.msrb.mxu0 %v1501_v31  ;;  %v1466_v49 = vld [vmem:[#allocation3 + $0x98] sm:$0xf0]  ;;  %704 = vmatpush.bf16.msra.mxu2 %v1477_v39  ;;  %v1465_v52 = vor.u32 %v1707_v47, %v1464_v46  ;;  %v425_v54 = vld [vmem:[%s2120_s15 + $0x10] sm:$0xff]  ;;  %v1440_v57 = vld [vmem:[#allocation3 + $0x60] sm:$0xf]  ;;  %s1281_s10 = scalar_lea.sflag [#allocation5], %s414_s25 }
  0x30   : > { %723 = vmatpush.bf16.msra.mxu3 %v1481_v43  ;;  %v1469_v53 = vor.u32 %v1705_v48, %v1466_v49  ;;  %v426_v55 = vld [vmem:[%s2120_s15 + $0x18] sm:$0xff]  ;;  %v1702_v58 = vld [vmem:[#allocation3 + $0x6c] sm:$0xf0]  ;;  %v1700_v59 = vld [vmem:[#allocation3 + $0x64] sm:$0xf]  ;;  %s1915_s30 = sshra.s32 %s1294_s14, 4  ;;  %s1916_s30 = int_to_ptr.hbm [resolvable:$true] %s1915_s30 }
  0x31   : > { %v428_v56 = vpack.c.bf16 %v426_v55, %v425_v54  ;;  %v1441_v60 = vor.u32 %v1702_v58, %v1440_v57  ;;  %v1442_v61 = vld [vmem:[#allocation3 + $0x70] sm:$0xf0]  ;;  %v1448_v62 = vld [vmem:[#allocation3 + $0x68] sm:$0xf]  ;;  %v1703_v63 = vld [vmem:[#allocation3 + $0x74] sm:$0xf0]  ;;  %p1922_p3 = scmp.lt.s32.totalorder %s1916_s30, %s2221_s11 }
  0x32   : > { %686 = vmatpush.bf16.msra.mxu1 %v1457_v50  ;;  %v1445_v0 = vor.u32 %v1700_v59, %v1442_v61  ;;  %v1449_v1 = vor.u32 %v1703_v63, %v1448_v62  ;;  %v1701_v2 = vld [vmem:[#allocation3 + $0x6c] sm:$0xf]  ;;  %v1450_v3 = vld [vmem:[#allocation3 + $0x78] sm:$0xf0]  ;;  %v1424_v5 = vld [vmem:[#allocation3 + $0x40] sm:$0xf] }
  0x33   : > { %742 = vmatpush.bf16.msrb.mxu0 %v1485_v44  ;;  %705 = vmatpush.bf16.msra.mxu2 %v1461_v51  ;;  %v1453_v4 = vor.u32 %v1701_v2, %v1450_v3  ;;  %v1698_v6 = vld [vmem:[#allocation3 + $0x4c] sm:$0xf0]  ;;  %v1696_v7 = vld [vmem:[#allocation3 + $0x44] sm:$0xf]  ;;  %v1426_v9 = vld [vmem:[#allocation3 + $0x50] sm:$0xf0] }
  0x34   : > { %724 = vmatpush.bf16.msra.mxu3 %v1465_v52  ;;  %v1425_v8 = vor.u32 %v1698_v6, %v1424_v5  ;;  %v1432_v10 = vld [vmem:[#allocation3 + $0x48] sm:$0xf]  ;;  %v1699_v11 = vld [vmem:[#allocation3 + $0x54] sm:$0xf0]  ;;  %v1429_v12 = vor.u32 %v1696_v7, %v1426_v9  ;;  %v1697_v14 = vld [vmem:[#allocation3 + $0x4c] sm:$0xf] }
  0x35   : > { %v1433_v13 = vor.u32 %v1699_v11, %v1432_v10  ;;  %v1434_v15 = vld [vmem:[#allocation3 + $0x58] sm:$0xf0]  ;;  %v1408_v17 = vld [vmem:[#allocation3 + $0x20] sm:$0xf]  ;;  %v1694_v18 = vld [vmem:[#allocation3 + $0x2c] sm:$0xf0] }
  0x36   : > { %687 = vmatpush.bf16.msra.mxu1 %v1441_v60  ;;  %v1437_v16 = vor.u32 %v1697_v14, %v1434_v15  ;;  %v1692_v19 = vld [vmem:[#allocation3 + $0x24] sm:$0xf]  ;;  %v1409_v20 = vor.u32 %v1694_v18, %v1408_v17  ;;  %v1410_v21 = vld [vmem:[#allocation3 + $0x30] sm:$0xf0]  ;;  %v1416_v22 = vld [vmem:[#allocation3 + $0x28] sm:$0xf] }
  0x37   : > { %743 = vmatpush.bf16.msrb.mxu0 %v1469_v53  ;;  %706 = vmatpush.bf16.msra.mxu2 %v1445_v0  ;;  %v1695_v23 = vld [vmem:[#allocation3 + $0x34] sm:$0xf0]  ;;  %v1413_v24 = vor.u32 %v1692_v19, %v1410_v21  ;;  %v1693_v26 = vld [vmem:[#allocation3 + $0x2c] sm:$0xf]  ;;  %v1418_v27 = vld [vmem:[#allocation3 + $0x38] sm:$0xf0] }
  0x38   : > { %725 = vmatpush.bf16.msra.mxu3 %v1449_v1  ;;  %v1417_v25 = vor.u32 %v1695_v23, %v1416_v22  ;;  %v1421_v28 = vor.u32 %v1693_v26, %v1418_v27  ;;  %v1392_v29 = vld [vmem:[#allocation3] sm:$0xf]  ;;  %v1690_v30 = vld [vmem:[#allocation3 + $0xc] sm:$0xf0]  ;;  %v1688_v31 = vld [vmem:[#allocation3 + $0x4] sm:$0xf] }
  0x39   : > { %v1393_v32 = vor.u32 %v1690_v30, %v1392_v29  ;;  %v1394_v33 = vld [vmem:[#allocation3 + $0x10] sm:$0xf0]  ;;  %v1400_v34 = vld [vmem:[#allocation3 + $0x8] sm:$0xf]  ;;  %v1691_v35 = vld [vmem:[#allocation3 + $0x14] sm:$0xf0] }
  0x3a   : > { %688 = vmatpush.bf16.msra.mxu1 %v1425_v8  ;;  %v1397_v36 = vor.u32 %v1688_v31, %v1394_v33  ;;  %v1401_v37 = vor.u32 %v1691_v35, %v1400_v34  ;;  %v1689_v38 = vld [vmem:[#allocation3 + $0xc] sm:$0xf]  ;;  %v1402_v39 = vld [vmem:[#allocation3 + $0x18] sm:$0xf0]  ;;  %v1726_v46 = vld [vmem:[#allocation6 + $0x30] sm:$0xff]  ;;  %s1917_s15 = scalar_lea.hbm %s1916_s30, 1 }
  0x3b   : > { %744 = vmatpush.bf16.msrb.mxu0 %v1453_v4  ;;  %707 = vmatpush.bf16.msra.mxu2 %v1429_v12  ;;  %v1405_v40 = vor.u32 %v1689_v38, %v1402_v39  ;;  %v1727_v42 = vld [vmem:[#allocation6 + $0x38] sm:$0xff]  ;;  %v1750_v47 = vld [vmem:[#allocation6 + $0xf0] sm:$0xff]  ;;  %v1725_v51 = vld [vmem:[#allocation6 + $0x28] sm:$0xff]  ;;  %p1918_p0 = scmp.ne.s32.totalorder %s1916_s30, %s1917_s15  ;;  %s1921_s18 = scalar_lea.hbm %s2221_s11, 2 }
  0x3c   : > { %1389 = vmatmul.msk.bf16.gmra.mxu0 %vm449_vm0, %v428_v56  ;;  %726 = vmatpush.bf16.msra.mxu3 %v1433_v13  ;;  %v1751_v43 = vld [vmem:[#allocation6 + $0xf8] sm:$0xff]  ;;  %v1734_v49 = vld [vmem:[#allocation6 + $0x70] sm:$0xff]  ;;  %v1749_v52 = vld [vmem:[#allocation6 + $0xe8] sm:$0xff]  ;;  %p1923_p4 = scmp.lt.s32.totalorder %s1921_s18, %s1917_s15 }
  0x3d   : > { %v1735_v44 = vld [vmem:[#allocation6 + $0x78] sm:$0xff]  ;;  %v1742_v50 = vld [vmem:[#allocation6 + $0xb0] sm:$0xff]  ;;  %v1733_v54 = vld [vmem:[#allocation6 + $0x68] sm:$0xff]  ;;  %p1919_p1 = pnand %p1918_p0, %p2081_p5 }
  0x3e   : > { %689 = vmatpush.bf16.msra.mxu1 %v1409_v20  ;;  %v1743_v45 = vld [vmem:[#allocation6 + $0xb8] sm:$0xff]  ;;  %v1741_v55 = vld [vmem:[#allocation6 + $0xa8] sm:$0xff]  ;;  %v1724_v58 = vld [vmem:[#allocation6 + $0x20] sm:$0xff]  ;;  %p1924_p7 = por %p1923_p4, %p1922_p3 }
  0x3f   : > { %745 = vmatpush.bf16.msrb.mxu0 %v1437_v16  ;;  %708 = vmatpush.bf16.msra.mxu2 %v1413_v24  ;;  %v1834_v48 = vld [vmem:[%s2212_s2] ss:$0 sm:$0xff]  ;;  %v1748_v59 = vld [vmem:[#allocation6 + $0xe0] sm:$0xff]  ;;  %v1722_v10 = vld [vmem:[#allocation6 + $0x10] sm:$0xff]  ;;  %p1920_p2 = pneg %p1919_p1 }
  0x40   : > { %727 = vmatpush.bf16.msra.mxu3 %v1417_v25  ;;  %v1723_v6 = vld [vmem:[#allocation6 + $0x18] sm:$0xff]  ;;  %v1732_v8 = vld [vmem:[#allocation6 + $0x60] sm:$0xff]  ;;  %v1746_v11 = vld [vmem:[#allocation6 + $0xd0] sm:$0xff] }
  0x41   : > { %v1747_v7 = vld [vmem:[#allocation6 + $0xd8] sm:$0xff]  ;;  %v1740_v9 = vld [vmem:[#allocation6 + $0xa0] sm:$0xff]  ;;  %v1721_v14 = vld [vmem:[#allocation6 + $0x8] sm:$0xff]  ;;  %p1925_p8 = pnand %p1924_p7, %p1920_p2 }
  0x42   : > { %690 = vmatpush.bf16.msra.mxu1 %v1393_v32  ;;  %v1731_v12 = vld [vmem:[#allocation6 + $0x58] sm:$0xff]  ;;  %v1745_v15 = vld [vmem:[#allocation6 + $0xc8] sm:$0xff]  ;;  %v1730_v16 = vld [vmem:[#allocation6 + $0x50] sm:$0xff] }
  0x43   : > { %746 = vmatpush.bf16.msrb.mxu0 %v1421_v28  ;;  %709 = vmatpush.bf16.msra.mxu2 %v1397_v36  ;;  %v1739_v13 = vld [vmem:[#allocation6 + $0x98] sm:$0xff]  ;;  %v1738_v17 = vld [vmem:[#allocation6 + $0x90] sm:$0xff]  ;;  %v1720_v18 = vld [vmem:[#allocation6] sm:$0xff] }
  0x44   : > { %728 = vmatpush.bf16.msra.mxu3 %v1401_v37  ;;  %v1744_v19 = vld [vmem:[#allocation6 + $0xc0] sm:$0xff]  ;;  %v1729_v20 = vld [vmem:[#allocation6 + $0x48] sm:$0xff] }
  0x45   : > { %v1737_v21 = vld [vmem:[#allocation6 + $0x88] sm:$0xff]  ;;  %v1728_v22 = vld [vmem:[#allocation6 + $0x40] sm:$0xff] }
  0x46   : > { %1043 = vmatpush.bf16.msrb.mxu1 %v1727_v42  ;;  %v1736_v23 = vld [vmem:[#allocation6 + $0x80] sm:$0xff] }
  0x47   : > { %747 = vmatpush.bf16.msrb.mxu0 %v1405_v40  ;;  %1062 = vmatpush.bf16.msrb.mxu2 %v1735_v44  ;;  %v513_v24 = vld [vmem:[%s2214_s4] sm:$0xf] }
  0x48   : > { %1081 = vmatpush.bf16.msrb.mxu3 %v1743_v45  ;;  %v515_v27 = vperm.slane %v513_v24, 0  ;;  %v518_v28 = vperm.slane %v513_v24, 3  ;;  %v516_v34 = vperm.slane %v513_v24, 1  ;;  %v517_v37 = vperm.slane %v513_v24, 2  ;;  %v1756_v24 = vld [vmem:[%s2217_s7 + $0x20] sm:$0xff] }
  0x4a   : > { %1044 = vmatpush.bf16.msrb.mxu1 %v1726_v46 }
  0x4b   : > { %1100 = vmatpush.bf16.msra.mxu0 %v1751_v43  ;;  %1063 = vmatpush.bf16.msrb.mxu2 %v1734_v49 }
  0x4c   : > { %1082 = vmatpush.bf16.msrb.mxu3 %v1742_v50 }
  0x4e   : > { %1045 = vmatpush.bf16.msrb.mxu1 %v1725_v51 }
  0x4f   : > { %1101 = vmatpush.bf16.msra.mxu0 %v1750_v47  ;;  %1064 = vmatpush.bf16.msrb.mxu2 %v1733_v54 }
  0x50   : > { %1083 = vmatpush.bf16.msrb.mxu3 %v1741_v55 }
  0x52   : > { %1046 = vmatpush.bf16.msrb.mxu1 %v1724_v58 }
  0x53   : > { %1102 = vmatpush.bf16.msra.mxu0 %v1749_v52  ;;  %1065 = vmatpush.bf16.msrb.mxu2 %v1732_v8 }
  0x54   : > { %1084 = vmatpush.bf16.msrb.mxu3 %v1740_v9 }
  0x56   : > { %1047 = vmatpush.bf16.msrb.mxu1 %v1723_v6 }
  0x57   : > { %1103 = vmatpush.bf16.msra.mxu0 %v1748_v59  ;;  %1066 = vmatpush.bf16.msrb.mxu2 %v1731_v12 }
  0x58   : > { %1085 = vmatpush.bf16.msrb.mxu3 %v1739_v13 }
  0x5a   : > { %1048 = vmatpush.bf16.msrb.mxu1 %v1722_v10 }
  0x5b   : > { %1104 = vmatpush.bf16.msra.mxu0 %v1747_v7  ;;  %1067 = vmatpush.bf16.msrb.mxu2 %v1730_v16 }
  0x5c   : > { %1086 = vmatpush.bf16.msrb.mxu3 %v1738_v17 }
  0x5e   : > { %1049 = vmatpush.bf16.msrb.mxu1 %v1721_v14 }
  0x5f   : > { %1105 = vmatpush.bf16.msra.mxu0 %v1746_v11  ;;  %1068 = vmatpush.bf16.msrb.mxu2 %v1729_v20 }
  0x60   : > { %1087 = vmatpush.bf16.msrb.mxu3 %v1737_v21  ;;  %v1759_v21 = vld [vmem:[%s2217_s7 + $0x38] sm:$0xff] }
  0x62   : > { %1050 = vmatpush.bf16.msrb.mxu1 %v1720_v18 }
  0x63   : > { %1106 = vmatpush.bf16.msra.mxu0 %v1745_v15  ;;  %1069 = vmatpush.bf16.msrb.mxu2 %v1728_v22  ;;  %v1758_v22 = vld [vmem:[%s2217_s7 + $0x30] sm:$0xff] }
  0x64   : > { %1088 = vmatpush.bf16.msrb.mxu3 %v1736_v23  ;;  %v1757_v23 = vld [vmem:[%s2217_s7 + $0x28] sm:$0xff] }
  0x67   : > { %1107 = vmatpush.bf16.msra.mxu0 %v1744_v19 }
  0xa9   : > { %v465_v41 = vpop.f32.mrf.mxu0 }
  0xaa   : > { %v466_v53 = vadd.f32 %v1834_v48, %v465_v41 }
  0xac   : > { %v475_v60 = vmax.f32 %v466_v53, 0.0 }
  0xb1   : > { %v467_v56 = vpop.f32.mrf.mxu0 }
  0xb2   : > { %v468_v57 = vadd.f32 %v1834_v48, %v467_v56 }
  0xb4   : > { %v476_v61 = vmax.f32 %v468_v57, 0.0 }
  0xb6   : > { %v479_v62 = vpack.c.bf16 %v476_v61, %v475_v60 }
  0xb8   : > { %691 = vmatmul.bf16.vlgmr.msra.gmra.mxu1 %v479_v62  ;;  %710 = vmatmul.bf16.vlgmr.msra.gmra.mxu2 %v479_v62 }
  0xb9   : > { %729 = vmatmul.bf16.vlgmr.msra.gmra.mxu3 %v479_v62  ;;  %748 = vmatmul.bf16.vlgmr.msrb.gmra.mxu0 %v479_v62  ;;  %v470_v63 = vpop.f32.mrf.mxu0 }
  0xba   : > { %v471_v0 = vadd.f32 %v1834_v48, %v470_v63  ;;  %1193 = vmatpush.bf16.msra.mxu1 %v1759_v21  ;;  %1760 = vmatpush.bf16.msra.mxu3 %v1759_v21 }
  0xbc   : > { %v477_v3 = vmax.f32 %v471_v0, 0.0 }
  0xbe   : > { %1194 = vmatpush.bf16.msra.mxu1 %v1758_v22  ;;  %1761 = vmatpush.bf16.msra.mxu3 %v1758_v22 }
  0xc1   : > { %v472_v1 = vpop.f32.mrf.mxu0 }
  0xc2   : > { %v473_v2 = vadd.f32 %v1834_v48, %v472_v1  ;;  %1195 = vmatpush.bf16.msra.mxu1 %v1757_v23  ;;  %1762 = vmatpush.bf16.msra.mxu3 %v1757_v23 }
  0xc4   : > { %v478_v4 = vmax.f32 %v473_v2, 0.0 }
  0xc6   : > { %v480_v5 = vpack.c.bf16 %v478_v4, %v477_v3  ;;  %1196 = vmatpush.bf16.msra.mxu1 %v1756_v24  ;;  %1763 = vmatpush.bf16.msra.mxu3 %v1756_v24 }
  0xc8   : > { %696 = vmatmul.bf16.gmra.mxu1 %v480_v5  ;;  %715 = vmatmul.bf16.gmra.mxu2 %v480_v5 }
  0xc9   : > { %734 = vmatmul.bf16.gmra.mxu3 %v480_v5  ;;  %753 = vmatmul.bf16.gmra.mxu0 %v480_v5 }
 0x135   : > { %v692_v25 = vpop.f32.mrf.mxu1 }
 0x136   : > { %v749_v26 = vpop.f32.mrf.mxu0  ;;  %v693_v30 = vadd.f32 %v692_v25, %v515_v27  ;;  %v1755_v25 = vld [vmem:[%s2217_s7 + $0x18] sm:$0xff] }
 0x137   : > { %v750_v32 = vadd.f32 %v749_v26, %v518_v28  ;;  %1197 = vmatpush.bf16.msra.mxu1 %v1755_v25  ;;  %1764 = vmatpush.bf16.msra.mxu3 %v1755_v25  ;;  %v1754_v26 = vld [vmem:[%s2217_s7 + $0x10] sm:$0xff] }
 0x138   : > { %v759_v39 = vmax.f32 %v693_v30, 0.0  ;;  %v1835_v30 = vld [vmem:[%s2216_s6] ss:$0 sm:$0xff] }
 0x139   : > { %v762_v41 = vmax.f32 %v750_v32, 0.0 }
 0x13b   : > { %v711_v29 = vpop.f32.mrf.mxu2  ;;  %1198 = vmatpush.bf16.msra.mxu1 %v1754_v26  ;;  %1765 = vmatpush.bf16.msra.mxu3 %v1754_v26 }
 0x13c   : > { %v730_v31 = vpop.f32.mrf.mxu3  ;;  %v712_v43 = vadd.f32 %v711_v29, %v516_v34 }
 0x13d   : > { %v694_v33 = vpop.f32.mrf.mxu1  ;;  %v731_v45 = vadd.f32 %v730_v31, %v517_v37 }
 0x13e   : > { %v695_v35 = vadd.f32 %v694_v33, %v515_v27  ;;  %v751_v36 = vpop.f32.mrf.mxu0  ;;  %v760_v52 = vmax.f32 %v712_v43, 0.0 }
 0x13f   : > { %v752_v38 = vadd.f32 %v751_v36, %v518_v28  ;;  %v761_v55 = vmax.f32 %v731_v45, 0.0 }
 0x140   : > { %v763_v40 = vmax.f32 %v695_v35, 0.0 }
 0x141   : > { %v766_v42 = vmax.f32 %v752_v38, 0.0 }
 0x142   : > { %v775_v44 = vpack.c.bf16 %v763_v40, %v759_v39 }
 0x143   : > { %v778_v46 = vpack.c.bf16 %v766_v42, %v762_v41  ;;  %v713_v47 = vpop.f32.mrf.mxu2 }
 0x144   : > { %v714_v48 = vadd.f32 %v713_v47, %v516_v34  ;;  %v732_v49 = vpop.f32.mrf.mxu3  ;;  %1051 = vmatmul.bf16.vlgmr.msrb.gmra.mxu1 %v775_v44 }
 0x145   : > { %v733_v50 = vadd.f32 %v732_v49, %v517_v37  ;;  %1108 = vmatmul.bf16.vlgmr.msra.gmra.mxu0 %v778_v46  ;;  %v697_v51 = vpop.f32.mrf.mxu1 }
 0x146   : > { %v764_v53 = vmax.f32 %v714_v48, 0.0  ;;  %v754_v54 = vpop.f32.mrf.mxu0  ;;  %v698_v60 = vadd.f32 %v697_v51, %v515_v27 }
 0x147   : > { %v765_v56 = vmax.f32 %v733_v50, 0.0  ;;  %v755_v62 = vadd.f32 %v754_v54, %v518_v28 }
 0x148   : > { %v776_v57 = vpack.c.bf16 %v764_v53, %v760_v52  ;;  %v767_v3 = vmax.f32 %v698_v60, 0.0 }
 0x149   : > { %v777_v58 = vpack.c.bf16 %v765_v56, %v761_v55  ;;  %v770_v5 = vmax.f32 %v755_v62, 0.0 }
 0x14a   : > { %1070 = vmatmul.bf16.vlgmr.msrb.gmra.mxu2 %v776_v57 }
 0x14b   : > { %1089 = vmatmul.bf16.vlgmr.msrb.gmra.mxu3 %v777_v58  ;;  %v716_v59 = vpop.f32.mrf.mxu2 }
 0x14c   : > { %v735_v61 = vpop.f32.mrf.mxu3  ;;  %v717_v7 = vadd.f32 %v716_v59, %v516_v34 }
 0x14d   : > { %v699_v63 = vpop.f32.mrf.mxu1  ;;  %v736_v9 = vadd.f32 %v735_v61, %v517_v37 }
 0x14e   : > { %v700_v0 = vadd.f32 %v699_v63, %v515_v27  ;;  %v756_v1 = vpop.f32.mrf.mxu0  ;;  %v768_v15 = vmax.f32 %v717_v7, 0.0  ;;  %v1753_v27 = vld [vmem:[%s2217_s7 + $0x8] sm:$0xff] }
 0x14f   : > { %v757_v2 = vadd.f32 %v756_v1, %v518_v28  ;;  %v769_v17 = vmax.f32 %v736_v9, 0.0  ;;  %1199 = vmatpush.bf16.msra.mxu1 %v1753_v27  ;;  %1766 = vmatpush.bf16.msra.mxu3 %v1753_v27  ;;  %v1752_v28 = vld [vmem:[%s2217_s7] sm:$0xff] }
 0x150   : > { %v771_v4 = vmax.f32 %v700_v0, 0.0 }
 0x151   : > { %v774_v6 = vmax.f32 %v757_v2, 0.0 }
 0x152   : > { %v779_v8 = vpack.c.bf16 %v771_v4, %v767_v3  ;;  %v1217_v4 = vld [vmem:[#allocation2] sm:$0x1] }
 0x153   : > { %v718_v10 = vpop.f32.mrf.mxu2  ;;  %v782_v11 = vpack.c.bf16 %v774_v6, %v770_v5  ;;  %1200 = vmatpush.bf16.msra.mxu1 %v1752_v28  ;;  %1767 = vmatpush.bf16.msra.mxu3 %v1752_v28  ;;  %v1979_v5 = vmov 0  }
 0x154   : > { %v719_v12 = vadd.f32 %v718_v10, %v516_v34  ;;  %v737_v13 = vpop.f32.mrf.mxu3  ;;  %1056 = vmatmul.bf16.gmra.mxu1 %v779_v8  ;;  %1833 = vset.pattern.permute.xlu0 %v1979_v5  ;;  %v1836_v8 = vld [vmem:[%s2218_s8] ss:$0 sm:$0xff] }
 0x155   : > { %v738_v14 = vadd.f32 %v737_v13, %v517_v37  ;;  %1113 = vmatmul.bf16.gmra.mxu0 %v782_v11  ;;  %1220 = vperm.xlu0 %1833, %v1217_v4  }
 0x156   : > { %v772_v16 = vmax.f32 %v719_v12, 0.0 }
 0x157   : > { %v773_v18 = vmax.f32 %v738_v14, 0.0 }
 0x158   : > { %v780_v19 = vpack.c.bf16 %v772_v16, %v768_v15 }
 0x159   : > { %v781_v20 = vpack.c.bf16 %v773_v18, %v769_v17 }
 0x15a   : > { %1075 = vmatmul.bf16.gmra.mxu2 %v780_v19  ;;  %v1216_v19 = vld [vmem:[%s2219_s9] sm:$0x1] }
 0x15b   : > { %1094 = vmatmul.bf16.gmra.mxu3 %v781_v20 }
 0x1c1   : > { %v1052_v29 = vpop.f32.mrf.mxu1 }
 0x1c2   : > { %v1109_v31 = vpop.f32.mrf.mxu0  ;;  %v1053_v34 = vadd.f32 %v1835_v30, %v1052_v29 }
 0x1c7   : > { %v1221_v20 = vpop.permute.xlu0 %1220 }
 0x1c8   : > { %v1223_v21 = vperm.slane %v1221_v20, 0 }
 0x1c9   : > { %v1054_v32 = vpop.f32.mrf.mxu1 }
 0x1ca   : > { %v1055_v37 = vadd.f32 %v1835_v30, %v1054_v32  ;;  %v1111_v39 = vpop.f32.mrf.mxu0 }
 0x1cd   : > { %v1071_v33 = vpop.f32.mrf.mxu2 }
 0x1ce   : > { %v1090_v35 = vpop.f32.mrf.mxu3  ;;  %v1072_v36 = vadd.f32 %v1071_v33, %v1053_v34 }
 0x1d0   : > { %v1091_v38 = vadd.f32 %v1090_v35, %v1072_v36 }
 0x1d1   : > { %v1057_v43 = vpop.f32.mrf.mxu1 }
 0x1d2   : > { %v1110_v44 = vadd.f32 %v1109_v31, %v1091_v38  ;;  %v1058_v50 = vadd.f32 %v1835_v30, %v1057_v43  ;;  %v1114_v53 = vpop.f32.mrf.mxu0 }
 0x1d4   : > { %v1119_v47 = vmax.f32 %v1110_v44, 0.0 }
 0x1d5   : > { %v1073_v40 = vpop.f32.mrf.mxu2 }
 0x1d6   : > { %v1074_v41 = vadd.f32 %v1073_v40, %v1055_v37  ;;  %v1092_v42 = vpop.f32.mrf.mxu3 }
 0x1d8   : > { %v1093_v45 = vadd.f32 %v1092_v42, %v1074_v41 }
 0x1d9   : > { %v1059_v55 = vpop.f32.mrf.mxu1 }
 0x1da   : > { %v1112_v46 = vadd.f32 %v1111_v39, %v1093_v45  ;;  %v1060_v56 = vadd.f32 %v1835_v30, %v1059_v55  ;;  %v1116_v63 = vpop.f32.mrf.mxu0 }
 0x1dc   : > { %v1120_v48 = vmax.f32 %v1112_v46, 0.0 }
 0x1dd   : > { %v1076_v49 = vpop.f32.mrf.mxu2 }
 0x1de   : > { %v1123_v51 = vpack.c.bf16 %v1120_v48, %v1119_v47  ;;  %v1095_v52 = vpop.f32.mrf.mxu3  ;;  %v1077_v54 = vadd.f32 %v1076_v49, %v1058_v50 }
 0x1e0   : > { %1201 = vmatmul.bf16.vlgmr.msra.gmra.mxu1 %v1123_v51  ;;  %v1096_v57 = vadd.f32 %v1095_v52, %v1077_v54 }
 0x1e2   : > { %v1115_v61 = vadd.f32 %v1114_v53, %v1096_v57 }
 0x1e4   : > { %v1121_v1 = vmax.f32 %v1115_v61, 0.0 }
 0x1e5   : > { %v1078_v58 = vpop.f32.mrf.mxu2 }
 0x1e6   : > { %v1079_v59 = vadd.f32 %v1078_v58, %v1060_v56  ;;  %v1097_v60 = vpop.f32.mrf.mxu3 }
 0x1e8   : > { %v1098_v62 = vadd.f32 %v1097_v60, %v1079_v59 }
 0x1ea   : > { %v1117_v0 = vadd.f32 %v1116_v63, %v1098_v62 }
 0x1ec   : > { %v1122_v2 = vmax.f32 %v1117_v0, 0.0 }
 0x1ee   : > { %v1124_v3 = vpack.c.bf16 %v1122_v2, %v1121_v1 }
 0x1f0   : > { %1206 = vmatmul.bf16.vlgmr.msra.gmra.mxu3 %v1124_v3 }
 0x25d   : > { %v1202_v7 = vpop.f32.mrf.mxu1 }
 0x25e   : > { %v1203_v16 = vadd.f32 %v1836_v8, %v1202_v7 }
 0x260   : > { %v1212_v18 = vmax.f32 %v1203_v16, 0.0 }
 0x265   : > { %v1204_v13 = vpop.f32.mrf.mxu1 }
 0x266   : > { %v1205_v14 = vadd.f32 %v1836_v8, %v1204_v13 }
 0x268   : > { %v1213_v17 = vmax.f32 %v1205_v14, 0.0 }
 0x273   : > { %v1207_v6 = vpop.f32.mrf.mxu3 }
 0x274   : > { %v1208_v11 = vadd.f32 %v1836_v8, %v1207_v6 }
 0x276   : > { %v1214_v15 = vmax.f32 %v1208_v11, 0.0 }
 0x27b   : > { %v1209_v9 = vpop.f32.mrf.mxu3 }
 0x27c   : > { %v1210_v10 = vadd.f32 %v1836_v8, %v1209_v9 }
 0x27e   : > { %v1215_v12 = vmax.f32 %v1210_v10, 0.0 }
 0x280   : > { %1678 = vmatpush.xpose.msk.msra.mxu2 %vm449_vm0, %v1215_v12 }
 0x284   : > { %1679 = vmatpush.xpose.msk.msra.mxu2 %vm449_vm0, %v1214_v15 }
 0x288   : > { %1680 = vmatpush.xpose.msk.msra.mxu2 %vm449_vm0, %v1213_v17 }
 0x28c   : > { %1681 = vmatpush.xpose.msk.msra.mxu2 %vm449_vm0, %v1212_v18 }
 0x28f   : > { %1682 = vmatmul.msk.f32.vlgmr.msra.gmra.mxu2 %vm449_vm0, %v1216_v19 }
 0x312   : > { %v1256_v22 = vpop.f32.mrf.mxu2 }
 0x313   : > { %v1257_v23 = vadd.f32 %v1256_v22, %v1223_v21 }
 0x315   : > { %v1683_v24 = vmul.f32 -1.442695, %v1257_v23 }
 0x317   : > { %1837 = vpow2.f32 %v1683_v24 }
 0x31d   : > { %v1838_v25 = vpop.eup %1837 }
 0x31e   : > { %v1262_v26 = vadd.f32 1.0, %v1838_v25 }
 0x320   : > { %1839 = vrcp.f32 %v1262_v26  ;;  %v1274_v30 = vand.u32 2147483648, %v1262_v26  ;;  %v1272_v32 = vand.u32 2147483647, %v1262_v26  ;;  %vm1268_vm2 = vweird.f32 %v1262_v26 }
 0x322   : > { %v1275_v34 = vor.u32 1.1754944e-38, %v1274_v30  ;;  %vm1273_vm5 = vcmp.eq.f32.partialorder %v1272_v32, 8.507059e+37 }
 0x326   : > { %v1840_v27 = vpop.eup %1839 }
 0x327   : > { %v1264_v28 = vmul.f32 %v1840_v27, %v1262_v26  ;;  %vm1269_vm1 = vweird.f32 %v1840_v27 }
 0x328   : > { %vm1270_vm3 = vmor %vm1268_vm2, %vm1269_vm1 }
 0x329   : > { %v1265_v29 = vsub.f32 1.0, %v1264_v28 }
 0x32b   : > { %v1266_v31 = vmul.f32 %v1840_v27, %v1265_v29 }
 0x32d   : > { %v1267_v33 = vadd.f32 %v1840_v27, %v1266_v31 }
 0x32f   : > { %v1271_v35 = vsel %vm1270_vm3, %v1840_v27, %v1267_v33 }
 0x330   : > { %v1276_v36 = vsel %vm1273_vm5, %v1275_v34, %v1271_v35 }
 0x331   : > { %1279 = vst.msk [vmem:[%s415_s27] sm:$0x1] %vm1278_vm4, %v1276_v36 }
 0x332   : > { %1928 = shalt.err (!%p1925_p8)
}
 0x333   : > { %1776 = dma.vmem_to_hbm [thread:$0]  (%p2081_p5), %s1292_s3, 16, %s1294_s14, %s1281_s10  }
 0x334 PF: > { %p1793_p9 = scmp.ge.s32.totalorder %s1971_s22, 2  ;;  %s1305_s25 = sand.u32 1, %s1959_s19  }
 0x335   : > { %s1306_s12 = scalar_lea.sflag [#allocation5], %s1305_s25 }
 0x336   : > { %p1786_p10 = pnand %p1793_p9, %p2085_p6 }
 0x338   : > { %p1787_p11 = pneg %p1786_p10 }
 0x33a   : > { %1954 = dma.done.wait (%p1787_p11), %s1306_s12, 16  }
 0x33b   : > { %1956 = vsyncadd (%p1787_p11), %s1306_s12, 4294967280  ;;  %s2228_s13 = sld [smem:[#allocation12_spill]]  ;;  %p25_p12 = scmp.ge.s32.totalorder %s2068_s24, 4  }
 0x33c   : > { %s2229_s19 = smov %s1963_s20  ;;  %s2230_s20 = smov %s1967_s21 }
 0x33d   : > { %s2232_s22 = smov %s2068_s24  ;;  %27 = sbr.rel (!%p25_p12) target bundleno = 8 (0x8), region = 108 }
 0x341   : > { %s2231_s21 = smov %s2228_s13 }
 0x342   :  { %1311 = vsyncpa [#allocation4], 1 }
 0x343   :  { %1313 = vsyncpa [#allocation4 + $0x1], 1 }
 0x344   :  { %1314 = vsyncpa [#allocation7], 1 }
 0x345   :  { %1315 = vsyncpa [#allocation5], 1 }
 0x346   :  { %1317 = vsyncpa [#allocation5 + $0x1], 1 }

</bundles_post_ra>
